<compile_context>
chip_gen: v5e
topology: v5e:2x2
jax: 0.10.0
libtpu: 0.0.40
codegen_flags: <defaults>
</compile_context>

<pallas_src>
import numpy as np

import jax
import jax.numpy as jnp
from jax.experimental import pallas as pl
from jax.experimental.pallas import tpu as pltpu

# ----------------------------- model hyper-parameters -----------------------------
B, C, H, W = 2, 3, 32, 32          # small NCHW image like the PyTorch module
PATCH = 16                         # patch / stride size
NP_H, NP_W = H // PATCH, W // PATCH
NUM_PATCHES = NP_H * NP_W          # 4
D = 128                            # in_planes (embed dim), lane friendly
HEADS = 4
DH = D // HEADS                    # 32
MLP = 256
DEPTH = 2
NB_SEM = 4                         # part tokens used: tokens[:, 1 .. NB_SEM]
NUM_CLASSES = 16
NB_DOMAIN = 8
SEQ = 1 + NUM_PATCHES              # cls + patches = 5
SEQ_PAD = 8                        # pad per-image token count to a full sublane group
BT = B * SEQ_PAD                   # 16 token rows total (multiple of 8)
HEAD_COLS = 128                    # fused classifier output padded to a full lane tile
PATCH_DIM = C * PATCH * PATCH      # 768
BN_EPS = 1e-5
LN_EPS = 1e-6
SCALE = 1.0 / (DH ** 0.5)
OFF_D = NUM_CLASSES                # domain-score column offset in the fused head slab
OFF_P = NUM_CLASSES + NB_DOMAIN    # part-score column offset
NEG = -1e30


# --------------------------------- in-kernel helpers --------------------------------
def _ln_rows(x, g, b, eps=LN_EPS):
    """Row-wise LayerNorm over the last (lane) axis, in f32."""
    xf = x.astype(jnp.float32)
    m = jnp.mean(xf, axis=-1, keepdims=True)
    c = xf - m
    v = jnp.mean(c * c, axis=-1, keepdims=True)
    return c * jax.lax.rsqrt(v + eps) * g + b


def _bn_batch(x, g, b, eps=BN_EPS):
    """Training-mode BatchNorm1d: biased batch statistics over axis 0."""
    m = jnp.mean(x, axis=0, keepdims=True)
    c = x - m
    v = jnp.mean(c * c, axis=0, keepdims=True)
    return c * jax.lax.rsqrt(v + eps) * g + b


# ------------------------------- fused forward kernel -------------------------------
def fused_ctc_vit_kernel(
    # header inputs (resident across all grid steps)
    patches_ref, patch_w_ref, patch_b_ref, scat_ref, pos_base_ref,
    cls_sel_ref, cls_scat_ref, mask_ref,
    # per-block inputs (stepped along the DEPTH grid axis)
    ln1_g_ref, ln1_b_ref, qkv_w_ref, q_b_ref, proj_w_ref, proj_b_ref,
    ln2_g_ref, ln2_b_ref, fc1_w_ref, fc1_b_ref, fc2_w_ref, fc2_b_ref,
    # tail inputs (used on the last step)
    norm_g_ref, norm_b_ref, bn_g_ref, bn_b_ref, w_head_ref,
    # outputs
    tok_out_ref, head_out_ref,
    # scratch (persists across grid steps)
    tok_ref,
):
    f32, bf16 = jnp.float32, jnp.bfloat16
    step = pl.program_id(0)

    # ---- patch embedding (Conv2d k=stride=PATCH as a matmul) + token assembly ----
    @pl.when(step == 0)
    def _():
        patch_tok = jnp.dot(patches_ref[...], patch_w_ref[...],
                            preferred_element_type=f32) + patch_b_ref[...]     # (B*NP, D)
        # scatter patch rows into the padded (BT, D) token layout; add cls/pos rows.
        tok_ref[...] = jnp.dot(scat_ref[...], patch_tok,
                               preferred_element_type=f32) + pos_base_ref[...]

    tok = tok_ref[...]

    # ---- one transformer block per grid step ----
    h = _ln_rows(tok, ln1_g_ref[...], ln1_b_ref[...])
    # single lane-dense QKV matmul, bf16 operands / f32 accumulation
    qkv = jnp.dot(h.astype(bf16), qkv_w_ref[...], preferred_element_type=f32)  # (BT, 3D)
    q_all = qkv[:, 0 * D:1 * D] + q_b_ref[...]
    k_all = qkv[:, 1 * D:2 * D]        # K bias dropped: softmax is shift-invariant per row
    v_all = qkv[:, 2 * D:3 * D]        # V bias folded into proj_b host-side
    mask_add = mask_ref[...]           # 0 / -1e30 (cross-image + padded-key mask)

    o_heads = []
    for hh in range(HEADS):
        lo, hi = hh * DH, (hh + 1) * DH
        q = q_all[:, lo:hi].astype(bf16)
        k = k_all[:, lo:hi].astype(bf16)
        v = v_all[:, lo:hi].astype(bf16)
        s = jax.lax.dot_general(q, k, (((1,), (1,)), ((), ())),
                                preferred_element_type=f32) * SCALE + mask_add  # (BT, BT)
        s = s - jnp.max(s, axis=-1, keepdims=True)
        p = jnp.exp(s)
        p = p * pl.reciprocal(jnp.sum(p, axis=-1, keepdims=True), approx=True)
        o_heads.append(jnp.dot(p.astype(bf16), v, preferred_element_type=f32))  # (BT, DH)
    o = jnp.concatenate(o_heads, axis=-1)                                        # (BT, D)
    tok = tok + jnp.dot(o.astype(bf16), proj_w_ref[...],
                        preferred_element_type=f32) + proj_b_ref[...]

    # MLP
    m = _ln_rows(tok, ln2_g_ref[...], ln2_b_ref[...])
    m = jnp.dot(m.astype(bf16), fc1_w_ref[...], preferred_element_type=f32) + fc1_b_ref[...]
    # TODO(synk): PyTorch nn.GELU defaults to exact erf; tanh approximation used here.
    m = jax.nn.gelu(m, approximate=True)
    m = jnp.dot(m.astype(bf16), fc2_w_ref[...], preferred_element_type=f32) + fc2_b_ref[...]
    tok = tok + m
    tok_ref[...] = tok

    # ---- final LayerNorm + BNNeck + fused classifier heads (last step only) ----
    @pl.when(step == pl.num_programs(0) - 1)
    def _():
        tok_f = _ln_rows(tok, norm_g_ref[...], norm_b_ref[...])
        tok_out_ref[...] = tok_f
        cls = jnp.dot(cls_sel_ref[...], tok_f, preferred_element_type=f32)      # (B, D)
        feat = _bn_batch(cls, bn_g_ref[...], bn_b_ref[...])                     # bottleneck
        # replace the cls rows of tok_f by the BN'd feature (matmul scatter of the delta)
        head_in = tok_f + jnp.dot(cls_scat_ref[...], feat - cls,
                                  preferred_element_type=f32)
        # fused lane-dense head matmul: cols [0:16]=classifier, [16:24]=D_classifier,
        # [24:40]=part_classifier, rest zero-padded.  GRL is identity in forward.
        head_out_ref[...] = jnp.dot(head_in.astype(bf16), w_head_ref[...],
                                    preferred_element_type=f32)


# ------------------------------- parameter construction -----------------------------
def init_params(key):
    keys = iter(jax.random.split(key, 64))

    def nrm(shape, std=0.02):
        return (std * jax.random.normal(next(keys), shape)).astype(jnp.float32)

    base = {
        "patch_w": nrm((PATCH_DIM, D)),          # conv(k=stride=patch) == matmul
        "patch_b": jnp.zeros((D,), jnp.float32),
        "cls_token": jnp.zeros((1, 1, D), jnp.float32),
        "pos_embed": nrm((1, SEQ, D)),
        "norm_g": jnp.ones((D,), jnp.float32),
        "norm_b": jnp.zeros((D,), jnp.float32),
        "blocks": [],
    }
    for _ in range(DEPTH):
        base["blocks"].append({
            "ln1_g": jnp.ones((D,), jnp.float32), "ln1_b": jnp.zeros((D,), jnp.float32),
            "qkv_w": nrm((D, 3 * D)), "qkv_b": jnp.zeros((3 * D,), jnp.float32),
            "proj_w": nrm((D, D)), "proj_b": jnp.zeros((D,), jnp.float32),
            "ln2_g": jnp.ones((D,), jnp.float32), "ln2_b": jnp.zeros((D,), jnp.float32),
            "fc1_w": nrm((D, MLP)), "fc1_b": jnp.zeros((MLP,), jnp.float32),
            "fc2_w": nrm((MLP, D)), "fc2_b": jnp.zeros((D,), jnp.float32),
        })

    return {
        "base": base,
        # bottleneck BatchNorm1d: weights_init_kaiming -> weight=1, bias=0
        "bn_g": jnp.ones((D,), jnp.float32),
        "bn_b": jnp.zeros((D,), jnp.float32),
        # classifier: weights_init_classifier -> normal(std=0.001), no bias
        "cls_w": nrm((D, NUM_CLASSES), std=0.001),
        # part_classifier / D_classifier: default Linear init (no bias), random stand-in
        "part_w": nrm((D, NUM_CLASSES), std=0.02),
        "d_w": nrm((D, NB_DOMAIN), std=0.02),
    }


def prepare_inputs(params):
    """One-time host-side packing into kernel-ready arrays (NOT redone per forward)."""
    base = params["base"]
    bf16 = jnp.bfloat16

    # host-constant 0/1 matrices for aligned (matmul-based) row scatter / gather
    scat = np.zeros((BT, B * NUM_PATCHES), np.float32)       # patch rows -> padded token rows
    cls_sel = np.zeros((B, BT), np.float32)                  # gather cls rows
    for b in range(B):
        cls_sel[b, b * SEQ_PAD] = 1.0
        for p_ in range(NUM_PATCHES):
            scat[b * SEQ_PAD + 1 + p_, b * NUM_PATCHES + p_] = 1.0
    cls_scat = np.ascontiguousarray(cls_sel.T)               # scatter BN'd feat back

    # additive attention mask: query i attends key j iff same image and j is a real token
    img_q = np.arange(BT) // SEQ_PAD
    real_k = (np.arange(BT) % SEQ_PAD) < SEQ
    allowed = (img_q[:, None] == img_q[None, :]) & real_k[None, :]
    mask_add = np.where(allowed, 0.0, NEG).astype(np.float32)

    # base row contents per image: row0 = cls_token + pos[0], rows 1..NP = pos[1..], rest 0
    pos = base["pos_embed"][0]                                # (SEQ, D)
    cls_row = (base["cls_token"][0, 0] + pos[0])[None, :]
    per_img = jnp.concatenate(
        [cls_row, pos[1:], jnp.zeros((SEQ_PAD - SEQ, D), jnp.float32)], axis=0)
    pos_base = jnp.tile(per_img, (B, 1))                      # (BT, D)

    # fused, lane-dense classifier weight slab (all heads share one matmul)
    w_head = jnp.zeros((D, HEAD_COLS), jnp.float32)
    w_head = w_head.at[:, :NUM_CLASSES].set(params["cls_w"])
    w_head = w_head.at[:, OFF_D:OFF_D + NB_DOMAIN].set(params["d_w"])
    w_head = w_head.at[:, OFF_P:OFF_P + NUM_CLASSES].set(params["part_w"])

    # per-block params stacked along a leading DEPTH axis (MXU weights in bf16)
    blocks = base["blocks"]

    def stack(fn, dtype=jnp.float32):
        return jnp.stack([fn(blk) for blk in blocks], axis=0).astype(dtype)

    blk_inputs = [
        stack(lambda b_: b_["ln1_g"].reshape(1, D)),
        stack(lambda b_: b_["ln1_b"].reshape(1, D)),
        stack(lambda b_: b_["qkv_w"], bf16),                              # (DEPTH, D, 3D)
        stack(lambda b_: b_["qkv_b"][:D].reshape(1, D)),                  # q bias only
        stack(lambda b_: b_["proj_w"], bf16),                             # (DEPTH, D, D)
        stack(lambda b_: (b_["proj_b"]
                          + b_["qkv_b"][2 * D:] @ b_["proj_w"]).reshape(1, D)),  # + v bias fold
        stack(lambda b_: b_["ln2_g"].reshape(1, D)),
        stack(lambda b_: b_["ln2_b"].reshape(1, D)),
        stack(lambda b_: b_["fc1_w"], bf16),
        stack(lambda b_: b_["fc1_b"].reshape(1, MLP)),
        stack(lambda b_: b_["fc2_w"], bf16),
        stack(lambda b_: b_["fc2_b"].reshape(1, D)),
    ]

    header = [base["patch_w"].astype(bf16), base["patch_b"].reshape(1, D),
              jnp.asarray(scat), pos_base, jnp.asarray(cls_sel),
              jnp.asarray(cls_scat), jnp.asarray(mask_add)]
    tail = [base["norm_g"].reshape(1, D), base["norm_b"].reshape(1, D),
            params["bn_g"].reshape(1, D), params["bn_b"].reshape(1, D),
            w_head.astype(bf16)]
    return {"header": header, "blocks": blk_inputs, "tail": tail}


# ---------------------------------- model forward -----------------------------------
def ctc_vit_forward(x, prepped):
    """Training-mode forward of build_ctc_vit, fused into a single Pallas kernel."""
    Bm = x.shape[0]
    assert Bm == B

    # NCHW -> non-overlapping patches (B*NP, C*ph*pw); flatten order matches Conv2d (C, ph, pw).
    xp = x.reshape(Bm, C, NP_H, PATCH, NP_W, PATCH)
    xp = xp.transpose(0, 2, 4, 1, 3, 5).reshape(Bm * NUM_PATCHES, PATCH_DIM)
    xp = xp.astype(jnp.bfloat16)

    inputs = [xp] + prepped["header"] + prepped["blocks"] + prepped["tail"]

    def full_spec(a):
        shape = tuple(int(s) for s in a.shape)
        nd = len(shape)
        return pl.BlockSpec(shape, lambda d, _nd=nd: (0,) * _nd)     # DMA'd once, resident

    def blk_spec(a):
        shape = tuple(int(s) for s in a.shape[1:])
        nd = len(shape)
        return pl.BlockSpec((None,) + shape,
                            lambda d, _nd=nd: (d,) + (0,) * _nd)     # stepped per block

    in_specs = ([full_spec(xp)] + [full_spec(a) for a in prepped["header"]]
                + [blk_spec(a) for a in prepped["blocks"]]
                + [full_spec(a) for a in prepped["tail"]])
    out_specs = (pl.BlockSpec((BT, D), lambda d: (0, 0)),
                 pl.BlockSpec((BT, HEAD_COLS), lambda d: (0, 0)))

    tok_out, head_out = pl.pallas_call(
        fused_ctc_vit_kernel,
        grid_spec=pltpu.PrefetchScalarGridSpec(
            num_scalar_prefetch=0,
            grid=(DEPTH,),
            in_specs=in_specs,
            out_specs=out_specs,
            scratch_shapes=[pltpu.VMEM((BT, D), jnp.float32)]),
        out_shape=(jax.ShapeDtypeStruct((BT, D), jnp.float32),
                   jax.ShapeDtypeStruct((BT, HEAD_COLS), jnp.float32)),
        compiler_params=pltpu.CompilerParams(dimension_semantics=("arbitrary",)),
    )(*inputs)

    tokens = tok_out.reshape(Bm, SEQ_PAD, D)
    head = head_out.reshape(Bm, SEQ_PAD, HEAD_COLS)

    cls_out = tokens[:, 0, :]                                         # layerwise_cls_tokens
    part_feat_list = [tokens[:, i, :] for i in range(1, NB_SEM + 1)]  # raw part tokens
    cls_score = head[:, 0, :NUM_CLASSES]                              # classifier(feat)
    d_score = head[:, 0, OFF_D:OFF_D + NB_DOMAIN]                     # D_classifier(GRL(feat))
    part_cls_score = [head[:, i, OFF_P:OFF_P + NUM_CLASSES] for i in range(1, NB_SEM + 1)]
    # TODO(synk): dropout / drop-path of the pretrained TransReID backbone omitted
    # (cfg defaults them to 0; identity in this forward).
    return cls_score, cls_out, part_feat_list, d_score, part_cls_score


# -------------------------------------- main ----------------------------------------
if __name__ == "__main__":
    key = jax.random.PRNGKey(0)
    k_x, k_p = jax.random.split(key)
    x = jax.random.normal(k_x, (B, C, H, W), jnp.float32)             # NCHW input
    params = init_params(k_p)
    prepped = prepare_inputs(params)                                   # one-time packing

    fwd = jax.jit(ctc_vit_forward)
    outs = fwd(x, prepped)
    jax.block_until_ready(outs)
    cls_score, cls_tokens, part_feats, d_score, part_scores = outs

    assert cls_score.shape == (B, NUM_CLASSES)
    assert cls_tokens.shape == (B, D)
    assert len(part_feats) == NB_SEM and part_feats[0].shape == (B, D)
    assert d_score.shape == (B, NB_DOMAIN)
    assert len(part_scores) == NB_SEM and part_scores[0].shape == (B, NUM_CLASSES)
    assert bool(jnp.isfinite(cls_score).all()) and bool(jnp.isfinite(d_score).all())
    assert bool(jnp.isfinite(cls_tokens).all())
    print("KERNEL_OK")
</pallas_src>

<mosaic_0001>
module attributes {stable_mosaic.version = 11 : i64} {
  func.func @fused_ctc_vit_kernel(%arg0: i32, %arg1: memref<8x768xbf16, #tpu.memory_space<vmem>>, %arg2: memref<768x128xbf16, #tpu.memory_space<vmem>>, %arg3: memref<1x128xf32, #tpu.memory_space<vmem>>, %arg4: memref<16x8xf32, #tpu.memory_space<vmem>>, %arg5: memref<16x128xf32, #tpu.memory_space<vmem>>, %arg6: memref<2x16xf32, #tpu.memory_space<vmem>>, %arg7: memref<16x2xf32, #tpu.memory_space<vmem>>, %arg8: memref<16x16xf32, #tpu.memory_space<vmem>>, %arg9: memref<1x1x128xf32, #tpu.memory_space<vmem>>, %arg10: memref<1x1x128xf32, #tpu.memory_space<vmem>>, %arg11: memref<1x128x384xbf16, #tpu.memory_space<vmem>>, %arg12: memref<1x1x128xf32, #tpu.memory_space<vmem>>, %arg13: memref<1x128x128xbf16, #tpu.memory_space<vmem>>, %arg14: memref<1x1x128xf32, #tpu.memory_space<vmem>>, %arg15: memref<1x1x128xf32, #tpu.memory_space<vmem>>, %arg16: memref<1x1x128xf32, #tpu.memory_space<vmem>>, %arg17: memref<1x128x256xbf16, #tpu.memory_space<vmem>>, %arg18: memref<1x1x256xf32, #tpu.memory_space<vmem>>, %arg19: memref<1x256x128xbf16, #tpu.memory_space<vmem>>, %arg20: memref<1x1x128xf32, #tpu.memory_space<vmem>>, %arg21: memref<1x128xf32, #tpu.memory_space<vmem>>, %arg22: memref<1x128xf32, #tpu.memory_space<vmem>>, %arg23: memref<1x128xf32, #tpu.memory_space<vmem>>, %arg24: memref<1x128xf32, #tpu.memory_space<vmem>>, %arg25: memref<128x128xbf16, #tpu.memory_space<vmem>>, %arg26: memref<16x128xf32, #tpu.memory_space<vmem>>, %arg27: memref<16x128xf32, #tpu.memory_space<vmem>>, %arg28: memref<16x128xf32, #tpu.memory_space<vmem>>) attributes {dimension_semantics = [#tpu.dimension_semantics<arbitrary>], iteration_bounds = array<i64: 2>, scalar_prefetch = 0 : i64, scratch_operands = 1 : i64, tpu.core_type = #tpu.core_type<tc>, window_params = [{pipeline_mode = #tpu.pipeline_mode<synchronous>, transform_indices = @transform_0, window_bounds = array<i64: 8, 768>}, {pipeline_mode = #tpu.pipeline_mode<synchronous>, transform_indices = @transform_1, window_bounds = array<i64: 768, 128>}, {pipeline_mode = #tpu.pipeline_mode<synchronous>, transform_indices = @transform_2, window_bounds = array<i64: 1, 128>}, {pipeline_mode = #tpu.pipeline_mode<synchronous>, transform_indices = @transform_3, window_bounds = array<i64: 16, 8>}, {pipeline_mode = #tpu.pipeline_mode<synchronous>, transform_indices = @transform_4, window_bounds = array<i64: 16, 128>}, {pipeline_mode = #tpu.pipeline_mode<synchronous>, transform_indices = @transform_5, window_bounds = array<i64: 2, 16>}, {pipeline_mode = #tpu.pipeline_mode<synchronous>, transform_indices = @transform_6, window_bounds = array<i64: 16, 2>}, {pipeline_mode = #tpu.pipeline_mode<synchronous>, transform_indices = @transform_7, window_bounds = array<i64: 16, 16>}, {transform_indices = @transform_8, window_bounds = array<i64: 1, 1, 128>}, {transform_indices = @transform_9, window_bounds = array<i64: 1, 1, 128>}, {transform_indices = @transform_10, window_bounds = array<i64: 1, 128, 384>}, {transform_indices = @transform_11, window_bounds = array<i64: 1, 1, 128>}, {transform_indices = @transform_12, window_bounds = array<i64: 1, 128, 128>}, {transform_indices = @transform_13, window_bounds = array<i64: 1, 1, 128>}, {transform_indices = @transform_14, window_bounds = array<i64: 1, 1, 128>}, {transform_indices = @transform_15, window_bounds = array<i64: 1, 1, 128>}, {transform_indices = @transform_16, window_bounds = array<i64: 1, 128, 256>}, {transform_indices = @transform_17, window_bounds = array<i64: 1, 1, 256>}, {transform_indices = @transform_18, window_bounds = array<i64: 1, 256, 128>}, {transform_indices = @transform_19, window_bounds = array<i64: 1, 1, 128>}, {pipeline_mode = #tpu.pipeline_mode<synchronous>, transform_indices = @transform_20, window_bounds = array<i64: 1, 128>}, {pipeline_mode = #tpu.pipeline_mode<synchronous>, transform_indices = @transform_21, window_bounds = array<i64: 1, 128>}, {pipeline_mode = #tpu.pipeline_mode<synchronous>, transform_indices = @transform_22, window_bounds = array<i64: 1, 128>}, {pipeline_mode = #tpu.pipeline_mode<synchronous>, transform_indices = @transform_23, window_bounds = array<i64: 1, 128>}, {pipeline_mode = #tpu.pipeline_mode<synchronous>, transform_indices = @transform_24, window_bounds = array<i64: 128, 128>}, {pipeline_mode = #tpu.pipeline_mode<synchronous>, transform_indices = @transform_25, window_bounds = array<i64: 16, 128>}, {pipeline_mode = #tpu.pipeline_mode<synchronous>, transform_indices = @transform_26, window_bounds = array<i64: 16, 128>}]} {
    %c0_i32 = arith.constant 0 : i32
    %0 = arith.cmpi eq, %arg0, %c0_i32 : i32
    %1 = arith.extui %0 : i1 to i32
    %c0_i32_0 = arith.constant 0 : i32
    %2 = arith.cmpi ne, %1, %c0_i32_0 : i32
    scf.if %2 {
      %c0_80 = arith.constant 0 : index
      %c0_81 = arith.constant 0 : index
      %196 = vector.load %arg1[%c0_80, %c0_81] : memref<8x768xbf16, #tpu.memory_space<vmem>>, vector<8x768xbf16>
      %c0_82 = arith.constant 0 : index
      %c0_83 = arith.constant 0 : index
      %197 = vector.load %arg2[%c0_82, %c0_83] : memref<768x128xbf16, #tpu.memory_space<vmem>>, vector<768x128xbf16>
      %cst_84 = arith.constant dense<0.000000e+00> : vector<8x128xf32>
      %198 = tpu.matmul %196, %197, %cst_84 {dimension_numbers = #tpu.dot_dimension_numbers<[1], [0], [0], [1], [0, 0, 1, 1], [], []>} : vector<8x768xbf16>, vector<768x128xbf16>, vector<8x128xf32> -> vector<8x128xf32>
      %c0_85 = arith.constant 0 : index
      %c0_86 = arith.constant 0 : index
      %199 = vector.load %arg3[%c0_85, %c0_86] : memref<1x128xf32, #tpu.memory_space<vmem>>, vector<1x128xf32>
      %200 = vector.broadcast %199 : vector<1x128xf32> to vector<8x128xf32>
      %201 = arith.addf %198, %200 : vector<8x128xf32>
      %c0_87 = arith.constant 0 : index
      %c0_88 = arith.constant 0 : index
      %202 = vector.load %arg4[%c0_87, %c0_88] : memref<16x8xf32, #tpu.memory_space<vmem>>, vector<16x8xf32>
      %cst_89 = arith.constant dense<0.000000e+00> : vector<16x128xf32>
      %203 = tpu.matmul %202, %201, %cst_89 {dimension_numbers = #tpu.dot_dimension_numbers<[1], [0], [0], [1], [0, 0, 1, 1], [], []>} : vector<16x8xf32>, vector<8x128xf32>, vector<16x128xf32> -> vector<16x128xf32>
      %c0_90 = arith.constant 0 : index
      %c0_91 = arith.constant 0 : index
      %204 = vector.load %arg5[%c0_90, %c0_91] : memref<16x128xf32, #tpu.memory_space<vmem>>, vector<16x128xf32>
      %205 = arith.addf %203, %204 : vector<16x128xf32>
      %c0_92 = arith.constant 0 : index
      %c0_93 = arith.constant 0 : index
      %206 = vector.load %arg28[%c0_92, %c0_93] : memref<16x128xf32, #tpu.memory_space<vmem>>, vector<16x128xf32>
      tpu.vector_store %arg28[%c0_92, %c0_93], %205 {strides = array<i32>} : memref<16x128xf32, #tpu.memory_space<vmem>>, vector<16x128xf32>,
    } else {
    }
    %c0 = arith.constant 0 : index
    %c0_1 = arith.constant 0 : index
    %3 = vector.load %arg28[%c0, %c0_1] : memref<16x128xf32, #tpu.memory_space<vmem>>, vector<16x128xf32>
    %c0_2 = arith.constant 0 : index
    %c0_3 = arith.constant 0 : index
    %c0_4 = arith.constant 0 : index
    %4 = vector.load %arg9[%c0_2, %c0_3, %c0_4] : memref<1x1x128xf32, #tpu.memory_space<vmem>>, vector<1x1x128xf32>
    %5 = vector.shape_cast %4 : vector<1x1x128xf32> to vector<1x128xf32>
    %c0_5 = arith.constant 0 : index
    %c0_6 = arith.constant 0 : index
    %c0_7 = arith.constant 0 : index
    %6 = vector.load %arg10[%c0_5, %c0_6, %c0_7] : memref<1x1x128xf32, #tpu.memory_space<vmem>>, vector<1x1x128xf32>
    %7 = vector.shape_cast %6 : vector<1x1x128xf32> to vector<1x128xf32>
    %cst = arith.constant dense<0.000000e+00> : vector<16xf32>
    %8 = vector.multi_reduction <add>, %3, %cst [1] : vector<16x128xf32> to vector<16xf32>
    %9 = vector.shape_cast %8 : vector<16xf32> to vector<16x1xf32>
    %cst_8 = arith.constant 1.280000e+02 : f32
    %10 = vector.broadcast %cst_8 : f32 to vector<16x1xf32>
    %11 = arith.divf %9, %10 : vector<16x1xf32>
    %12 = vector.broadcast %11 : vector<16x1xf32> to vector<16x128xf32>
    %13 = arith.subf %3, %12 : vector<16x128xf32>
    %14 = arith.mulf %13, %13 : vector<16x128xf32>
    %cst_9 = arith.constant dense<0.000000e+00> : vector<16xf32>
    %15 = vector.multi_reduction <add>, %14, %cst_9 [1] : vector<16x128xf32> to vector<16xf32>
    %16 = vector.shape_cast %15 : vector<16xf32> to vector<16x1xf32>
    %cst_10 = arith.constant 1.280000e+02 : f32
    %17 = vector.broadcast %cst_10 : f32 to vector<16x1xf32>
    %18 = arith.divf %16, %17 : vector<16x1xf32>
    %cst_11 = arith.constant 9.99999997E-7 : f32
    %19 = vector.broadcast %cst_11 : f32 to vector<16x1xf32>
    %20 = arith.addf %18, %19 : vector<16x1xf32>
    %21 = math.rsqrt %20 : vector<16x1xf32>
    %22 = vector.broadcast %21 : vector<16x1xf32> to vector<16x128xf32>
    %23 = arith.mulf %13, %22 : vector<16x128xf32>
    %24 = vector.broadcast %5 : vector<1x128xf32> to vector<16x128xf32>
    %25 = arith.mulf %23, %24 : vector<16x128xf32>
    %26 = vector.broadcast %7 : vector<1x128xf32> to vector<16x128xf32>
    %27 = arith.addf %25, %26 : vector<16x128xf32>
    %28 = arith.truncf %27 : vector<16x128xf32> to vector<16x128xbf16>
    %c0_12 = arith.constant 0 : index
    %c0_13 = arith.constant 0 : index
    %c0_14 = arith.constant 0 : index
    %29 = vector.load %arg11[%c0_12, %c0_13, %c0_14] : memref<1x128x384xbf16, #tpu.memory_space<vmem>>, vector<1x128x384xbf16>
    %30 = vector.shape_cast %29 : vector<1x128x384xbf16> to vector<128x384xbf16>
    %cst_15 = arith.constant dense<0.000000e+00> : vector<16x384xf32>
    %31 = tpu.matmul %28, %30, %cst_15 {dimension_numbers = #tpu.dot_dimension_numbers<[1], [0], [0], [1], [0, 0, 1, 1], [], []>} : vector<16x128xbf16>, vector<128x384xbf16>, vector<16x384xf32> -> vector<16x384xf32>
    %32 = vector.extract_strided_slice %31 {offsets = [0, 0], sizes = [16, 128], strides = [1, 1]} : vector<16x384xf32> to vector<16x128xf32>
    %c0_16 = arith.constant 0 : index
    %c0_17 = arith.constant 0 : index
    %c0_18 = arith.constant 0 : index
    %33 = vector.load %arg12[%c0_16, %c0_17, %c0_18] : memref<1x1x128xf32, #tpu.memory_space<vmem>>, vector<1x1x128xf32>
    %34 = vector.shape_cast %33 : vector<1x1x128xf32> to vector<1x128xf32>
    %35 = vector.broadcast %34 : vector<1x128xf32> to vector<16x128xf32>
    %36 = arith.addf %32, %35 : vector<16x128xf32>
    %37 = vector.extract_strided_slice %31 {offsets = [0, 128], sizes = [16, 128], strides = [1, 1]} : vector<16x384xf32> to vector<16x128xf32>
    %38 = vector.extract_strided_slice %31 {offsets = [0, 256], sizes = [16, 128], strides = [1, 1]} : vector<16x384xf32> to vector<16x128xf32>
    %c0_19 = arith.constant 0 : index
    %c0_20 = arith.constant 0 : index
    %39 = vector.load %arg8[%c0_19, %c0_20] : memref<16x16xf32, #tpu.memory_space<vmem>>, vector<16x16xf32>
    %40 = vector.extract_strided_slice %36 {offsets = [0, 0], sizes = [16, 32], strides = [1, 1]} : vector<16x128xf32> to vector<16x32xf32>
    %41 = arith.truncf %40 : vector<16x32xf32> to vector<16x32xbf16>
    %42 = vector.extract_strided_slice %37 {offsets = [0, 0], sizes = [16, 32], strides = [1, 1]} : vector<16x128xf32> to vector<16x32xf32>
    %43 = arith.truncf %42 : vector<16x32xf32> to vector<16x32xbf16>
    %44 = vector.extract_strided_slice %38 {offsets = [0, 0], sizes = [16, 32], strides = [1, 1]} : vector<16x128xf32> to vector<16x32xf32>
    %45 = arith.truncf %44 : vector<16x32xf32> to vector<16x32xbf16>
    %cst_21 = arith.constant dense<0.000000e+00> : vector<16x16xf32>
    %46 = tpu.matmul %41, %43, %cst_21 {dimension_numbers = #tpu.dot_dimension_numbers<[1], [1], [0], [0], [0, 0, 1, 0], [], []>} : vector<16x32xbf16>, vector<16x32xbf16>, vector<16x16xf32> -> vector<16x16xf32>
    %cst_22 = arith.constant 0.176776692 : f32
    %47 = vector.broadcast %cst_22 : f32 to vector<16x16xf32>
    %48 = arith.mulf %46, %47 : vector<16x16xf32>
    %49 = arith.addf %48, %39 : vector<16x16xf32>
    %cst_23 = arith.constant dense<0xFF800000> : vector<16xf32>
    %50 = vector.multi_reduction <maximumf>, %49, %cst_23 [1] : vector<16x16xf32> to vector<16xf32>
    %51 = vector.shape_cast %50 : vector<16xf32> to vector<16x1xf32>
    %52 = vector.broadcast %51 : vector<16x1xf32> to vector<16x16xf32>
    %53 = arith.subf %49, %52 : vector<16x16xf32>
    %54 = math.exp %53 : vector<16x16xf32>
    %cst_24 = arith.constant dense<0.000000e+00> : vector<16xf32>
    %55 = vector.multi_reduction <add>, %54, %cst_24 [1] : vector<16x16xf32> to vector<16xf32>
    %56 = vector.shape_cast %55 : vector<16xf32> to vector<16x1xf32>
    %57 = tpu.reciprocal %56 {approx = true} : vector<16x1xf32> -> vector<16x1xf32>
    %58 = vector.broadcast %57 : vector<16x1xf32> to vector<16x16xf32>
    %59 = arith.mulf %54, %58 : vector<16x16xf32>
    %60 = arith.truncf %59 : vector<16x16xf32> to vector<16x16xbf16>
    %cst_25 = arith.constant dense<0.000000e+00> : vector<16x32xf32>
    %61 = tpu.matmul %60, %45, %cst_25 {dimension_numbers = #tpu.dot_dimension_numbers<[1], [0], [0], [1], [0, 0, 1, 1], [], []>} : vector<16x16xbf16>, vector<16x32xbf16>, vector<16x32xf32> -> vector<16x32xf32>
    %62 = vector.extract_strided_slice %36 {offsets = [0, 32], sizes = [16, 32], strides = [1, 1]} : vector<16x128xf32> to vector<16x32xf32>
    %63 = arith.truncf %62 : vector<16x32xf32> to vector<16x32xbf16>
    %64 = vector.extract_strided_slice %37 {offsets = [0, 32], sizes = [16, 32], strides = [1, 1]} : vector<16x128xf32> to vector<16x32xf32>
    %65 = arith.truncf %64 : vector<16x32xf32> to vector<16x32xbf16>
    %66 = vector.extract_strided_slice %38 {offsets = [0, 32], sizes = [16, 32], strides = [1, 1]} : vector<16x128xf32> to vector<16x32xf32>
    %67 = arith.truncf %66 : vector<16x32xf32> to vector<16x32xbf16>
    %cst_26 = arith.constant dense<0.000000e+00> : vector<16x16xf32>
    %68 = tpu.matmul %63, %65, %cst_26 {dimension_numbers = #tpu.dot_dimension_numbers<[1], [1], [0], [0], [0, 0, 1, 0], [], []>} : vector<16x32xbf16>, vector<16x32xbf16>, vector<16x16xf32> -> vector<16x16xf32>
    %cst_27 = arith.constant 0.176776692 : f32
    %69 = vector.broadcast %cst_27 : f32 to vector<16x16xf32>
    %70 = arith.mulf %68, %69 : vector<16x16xf32>
    %71 = arith.addf %70, %39 : vector<16x16xf32>
    %cst_28 = arith.constant dense<0xFF800000> : vector<16xf32>
    %72 = vector.multi_reduction <maximumf>, %71, %cst_28 [1] : vector<16x16xf32> to vector<16xf32>
    %73 = vector.shape_cast %72 : vector<16xf32> to vector<16x1xf32>
    %74 = vector.broadcast %73 : vector<16x1xf32> to vector<16x16xf32>
    %75 = arith.subf %71, %74 : vector<16x16xf32>
    %76 = math.exp %75 : vector<16x16xf32>
    %cst_29 = arith.constant dense<0.000000e+00> : vector<16xf32>
    %77 = vector.multi_reduction <add>, %76, %cst_29 [1] : vector<16x16xf32> to vector<16xf32>
    %78 = vector.shape_cast %77 : vector<16xf32> to vector<16x1xf32>
    %79 = tpu.reciprocal %78 {approx = true} : vector<16x1xf32> -> vector<16x1xf32>
    %80 = vector.broadcast %79 : vector<16x1xf32> to vector<16x16xf32>
    %81 = arith.mulf %76, %80 : vector<16x16xf32>
    %82 = arith.truncf %81 : vector<16x16xf32> to vector<16x16xbf16>
    %cst_30 = arith.constant dense<0.000000e+00> : vector<16x32xf32>
    %83 = tpu.matmul %82, %67, %cst_30 {dimension_numbers = #tpu.dot_dimension_numbers<[1], [0], [0], [1], [0, 0, 1, 1], [], []>} : vector<16x16xbf16>, vector<16x32xbf16>, vector<16x32xf32> -> vector<16x32xf32>
    %84 = vector.extract_strided_slice %36 {offsets = [0, 64], sizes = [16, 32], strides = [1, 1]} : vector<16x128xf32> to vector<16x32xf32>
    %85 = arith.truncf %84 : vector<16x32xf32> to vector<16x32xbf16>
    %86 = vector.extract_strided_slice %37 {offsets = [0, 64], sizes = [16, 32], strides = [1, 1]} : vector<16x128xf32> to vector<16x32xf32>
    %87 = arith.truncf %86 : vector<16x32xf32> to vector<16x32xbf16>
    %88 = vector.extract_strided_slice %38 {offsets = [0, 64], sizes = [16, 32], strides = [1, 1]} : vector<16x128xf32> to vector<16x32xf32>
    %89 = arith.truncf %88 : vector<16x32xf32> to vector<16x32xbf16>
    %cst_31 = arith.constant dense<0.000000e+00> : vector<16x16xf32>
    %90 = tpu.matmul %85, %87, %cst_31 {dimension_numbers = #tpu.dot_dimension_numbers<[1], [1], [0], [0], [0, 0, 1, 0], [], []>} : vector<16x32xbf16>, vector<16x32xbf16>, vector<16x16xf32> -> vector<16x16xf32>
    %cst_32 = arith.constant 0.176776692 : f32
    %91 = vector.broadcast %cst_32 : f32 to vector<16x16xf32>
    %92 = arith.mulf %90, %91 : vector<16x16xf32>
    %93 = arith.addf %92, %39 : vector<16x16xf32>
    %cst_33 = arith.constant dense<0xFF800000> : vector<16xf32>
    %94 = vector.multi_reduction <maximumf>, %93, %cst_33 [1] : vector<16x16xf32> to vector<16xf32>
    %95 = vector.shape_cast %94 : vector<16xf32> to vector<16x1xf32>
    %96 = vector.broadcast %95 : vector<16x1xf32> to vector<16x16xf32>
    %97 = arith.subf %93, %96 : vector<16x16xf32>
    %98 = math.exp %97 : vector<16x16xf32>
    %cst_34 = arith.constant dense<0.000000e+00> : vector<16xf32>
    %99 = vector.multi_reduction <add>, %98, %cst_34 [1] : vector<16x16xf32> to vector<16xf32>
    %100 = vector.shape_cast %99 : vector<16xf32> to vector<16x1xf32>
    %101 = tpu.reciprocal %100 {approx = true} : vector<16x1xf32> -> vector<16x1xf32>
    %102 = vector.broadcast %101 : vector<16x1xf32> to vector<16x16xf32>
    %103 = arith.mulf %98, %102 : vector<16x16xf32>
    %104 = arith.truncf %103 : vector<16x16xf32> to vector<16x16xbf16>
    %cst_35 = arith.constant dense<0.000000e+00> : vector<16x32xf32>
    %105 = tpu.matmul %104, %89, %cst_35 {dimension_numbers = #tpu.dot_dimension_numbers<[1], [0], [0], [1], [0, 0, 1, 1], [], []>} : vector<16x16xbf16>, vector<16x32xbf16>, vector<16x32xf32> -> vector<16x32xf32>
    %106 = vector.extract_strided_slice %36 {offsets = [0, 96], sizes = [16, 32], strides = [1, 1]} : vector<16x128xf32> to vector<16x32xf32>
    %107 = arith.truncf %106 : vector<16x32xf32> to vector<16x32xbf16>
    %108 = vector.extract_strided_slice %37 {offsets = [0, 96], sizes = [16, 32], strides = [1, 1]} : vector<16x128xf32> to vector<16x32xf32>
    %109 = arith.truncf %108 : vector<16x32xf32> to vector<16x32xbf16>
    %110 = vector.extract_strided_slice %38 {offsets = [0, 96], sizes = [16, 32], strides = [1, 1]} : vector<16x128xf32> to vector<16x32xf32>
    %111 = arith.truncf %110 : vector<16x32xf32> to vector<16x32xbf16>
    %cst_36 = arith.constant dense<0.000000e+00> : vector<16x16xf32>
    %112 = tpu.matmul %107, %109, %cst_36 {dimension_numbers = #tpu.dot_dimension_numbers<[1], [1], [0], [0], [0, 0, 1, 0], [], []>} : vector<16x32xbf16>, vector<16x32xbf16>, vector<16x16xf32> -> vector<16x16xf32>
    %cst_37 = arith.constant 0.176776692 : f32
    %113 = vector.broadcast %cst_37 : f32 to vector<16x16xf32>
    %114 = arith.mulf %112, %113 : vector<16x16xf32>
    %115 = arith.addf %114, %39 : vector<16x16xf32>
    %cst_38 = arith.constant dense<0xFF800000> : vector<16xf32>
    %116 = vector.multi_reduction <maximumf>, %115, %cst_38 [1] : vector<16x16xf32> to vector<16xf32>
    %117 = vector.shape_cast %116 : vector<16xf32> to vector<16x1xf32>
    %118 = vector.broadcast %117 : vector<16x1xf32> to vector<16x16xf32>
    %119 = arith.subf %115, %118 : vector<16x16xf32>
    %120 = math.exp %119 : vector<16x16xf32>
    %cst_39 = arith.constant dense<0.000000e+00> : vector<16xf32>
    %121 = vector.multi_reduction <add>, %120, %cst_39 [1] : vector<16x16xf32> to vector<16xf32>
    %122 = vector.shape_cast %121 : vector<16xf32> to vector<16x1xf32>
    %123 = tpu.reciprocal %122 {approx = true} : vector<16x1xf32> -> vector<16x1xf32>
    %124 = vector.broadcast %123 : vector<16x1xf32> to vector<16x16xf32>
    %125 = arith.mulf %120, %124 : vector<16x16xf32>
    %126 = arith.truncf %125 : vector<16x16xf32> to vector<16x16xbf16>
    %cst_40 = arith.constant dense<0.000000e+00> : vector<16x32xf32>
    %127 = tpu.matmul %126, %111, %cst_40 {dimension_numbers = #tpu.dot_dimension_numbers<[1], [0], [0], [1], [0, 0, 1, 1], [], []>} : vector<16x16xbf16>, vector<16x32xbf16>, vector<16x32xf32> -> vector<16x32xf32>
    %128 = tpu.concatenate %61, %83, %105, %127 in 1 : vector<16x32xf32>, vector<16x32xf32>, vector<16x32xf32>, vector<16x32xf32> -> vector<16x128xf32>
    %129 = arith.truncf %128 : vector<16x128xf32> to vector<16x128xbf16>
    %c0_41 = arith.constant 0 : index
    %c0_42 = arith.constant 0 : index
    %c0_43 = arith.constant 0 : index
    %130 = vector.load %arg13[%c0_41, %c0_42, %c0_43] : memref<1x128x128xbf16, #tpu.memory_space<vmem>>, vector<1x128x128xbf16>
    %131 = vector.shape_cast %130 : vector<1x128x128xbf16> to vector<128x128xbf16>
    %cst_44 = arith.constant dense<0.000000e+00> : vector<16x128xf32>
    %132 = tpu.matmul %129, %131, %cst_44 {dimension_numbers = #tpu.dot_dimension_numbers<[1], [0], [0], [1], [0, 0, 1, 1], [], []>} : vector<16x128xbf16>, vector<128x128xbf16>, vector<16x128xf32> -> vector<16x128xf32>
    %133 = arith.addf %3, %132 : vector<16x128xf32>
    %c0_45 = arith.constant 0 : index
    %c0_46 = arith.constant 0 : index
    %c0_47 = arith.constant 0 : index
    %134 = vector.load %arg14[%c0_45, %c0_46, %c0_47] : memref<1x1x128xf32, #tpu.memory_space<vmem>>, vector<1x1x128xf32>
    %135 = vector.shape_cast %134 : vector<1x1x128xf32> to vector<1x128xf32>
    %136 = vector.broadcast %135 : vector<1x128xf32> to vector<16x128xf32>
    %137 = arith.addf %133, %136 : vector<16x128xf32>
    %c0_48 = arith.constant 0 : index
    %c0_49 = arith.constant 0 : index
    %c0_50 = arith.constant 0 : index
    %138 = vector.load %arg15[%c0_48, %c0_49, %c0_50] : memref<1x1x128xf32, #tpu.memory_space<vmem>>, vector<1x1x128xf32>
    %139 = vector.shape_cast %138 : vector<1x1x128xf32> to vector<1x128xf32>
    %c0_51 = arith.constant 0 : index
    %c0_52 = arith.constant 0 : index
    %c0_53 = arith.constant 0 : index
    %140 = vector.load %arg16[%c0_51, %c0_52, %c0_53] : memref<1x1x128xf32, #tpu.memory_space<vmem>>, vector<1x1x128xf32>
    %141 = vector.shape_cast %140 : vector<1x1x128xf32> to vector<1x128xf32>
    %cst_54 = arith.constant dense<0.000000e+00> : vector<16xf32>
    %142 = vector.multi_reduction <add>, %137, %cst_54 [1] : vector<16x128xf32> to vector<16xf32>
    %143 = vector.shape_cast %142 : vector<16xf32> to vector<16x1xf32>
    %cst_55 = arith.constant 1.280000e+02 : f32
    %144 = vector.broadcast %cst_55 : f32 to vector<16x1xf32>
    %145 = arith.divf %143, %144 : vector<16x1xf32>
    %146 = vector.broadcast %145 : vector<16x1xf32> to vector<16x128xf32>
    %147 = arith.subf %137, %146 : vector<16x128xf32>
    %148 = arith.mulf %147, %147 : vector<16x128xf32>
    %cst_56 = arith.constant dense<0.000000e+00> : vector<16xf32>
    %149 = vector.multi_reduction <add>, %148, %cst_56 [1] : vector<16x128xf32> to vector<16xf32>
    %150 = vector.shape_cast %149 : vector<16xf32> to vector<16x1xf32>
    %cst_57 = arith.constant 1.280000e+02 : f32
    %151 = vector.broadcast %cst_57 : f32 to vector<16x1xf32>
    %152 = arith.divf %150, %151 : vector<16x1xf32>
    %cst_58 = arith.constant 9.99999997E-7 : f32
    %153 = vector.broadcast %cst_58 : f32 to vector<16x1xf32>
    %154 = arith.addf %152, %153 : vector<16x1xf32>
    %155 = math.rsqrt %154 : vector<16x1xf32>
    %156 = vector.broadcast %155 : vector<16x1xf32> to vector<16x128xf32>
    %157 = arith.mulf %147, %156 : vector<16x128xf32>
    %158 = vector.broadcast %139 : vector<1x128xf32> to vector<16x128xf32>
    %159 = arith.mulf %157, %158 : vector<16x128xf32>
    %160 = vector.broadcast %141 : vector<1x128xf32> to vector<16x128xf32>
    %161 = arith.addf %159, %160 : vector<16x128xf32>
    %162 = arith.truncf %161 : vector<16x128xf32> to vector<16x128xbf16>
    %c0_59 = arith.constant 0 : index
    %c0_60 = arith.constant 0 : index
    %c0_61 = arith.constant 0 : index
    %163 = vector.load %arg17[%c0_59, %c0_60, %c0_61] : memref<1x128x256xbf16, #tpu.memory_space<vmem>>, vector<1x128x256xbf16>
    %164 = vector.shape_cast %163 : vector<1x128x256xbf16> to vector<128x256xbf16>
    %cst_62 = arith.constant dense<0.000000e+00> : vector<16x256xf32>
    %165 = tpu.matmul %162, %164, %cst_62 {dimension_numbers = #tpu.dot_dimension_numbers<[1], [0], [0], [1], [0, 0, 1, 1], [], []>} : vector<16x128xbf16>, vector<128x256xbf16>, vector<16x256xf32> -> vector<16x256xf32>
    %c0_63 = arith.constant 0 : index
    %c0_64 = arith.constant 0 : index
    %c0_65 = arith.constant 0 : index
    %166 = vector.load %arg18[%c0_63, %c0_64, %c0_65] : memref<1x1x256xf32, #tpu.memory_space<vmem>>, vector<1x1x256xf32>
    %167 = vector.shape_cast %166 : vector<1x1x256xf32> to vector<1x256xf32>
    %168 = vector.broadcast %167 : vector<1x256xf32> to vector<16x256xf32>
    %169 = arith.addf %165, %168 : vector<16x256xf32>
    %170 = arith.mulf %169, %169 : vector<16x256xf32>
    %171 = arith.mulf %169, %170 : vector<16x256xf32>
    %cst_66 = arith.constant 4.471500e-02 : f32
    %172 = vector.broadcast %cst_66 : f32 to vector<16x256xf32>
    %173 = arith.mulf %172, %171 : vector<16x256xf32>
    %174 = arith.addf %169, %173 : vector<16x256xf32>
    %cst_67 = arith.constant 0.797884583 : f32
    %175 = vector.broadcast %cst_67 : f32 to vector<16x256xf32>
    %176 = arith.mulf %175, %174 : vector<16x256xf32>
    %177 = math.tanh %176 : vector<16x256xf32>
    %cst_68 = arith.constant 1.000000e+00 : f32
    %178 = vector.broadcast %cst_68 : f32 to vector<16x256xf32>
    %179 = arith.addf %178, %177 : vector<16x256xf32>
    %cst_69 = arith.constant 5.000000e-01 : f32
    %180 = vector.broadcast %cst_69 : f32 to vector<16x256xf32>
    %181 = arith.mulf %180, %179 : vector<16x256xf32>
    %182 = arith.mulf %169, %181 : vector<16x256xf32>
    %183 = arith.truncf %182 : vector<16x256xf32> to vector<16x256xbf16>
    %c0_70 = arith.constant 0 : index
    %c0_71 = arith.constant 0 : index
    %c0_72 = arith.constant 0 : index
    %184 = vector.load %arg19[%c0_70, %c0_71, %c0_72] : memref<1x256x128xbf16, #tpu.memory_space<vmem>>, vector<1x256x128xbf16>
    %185 = vector.shape_cast %184 : vector<1x256x128xbf16> to vector<256x128xbf16>
    %cst_73 = arith.constant dense<0.000000e+00> : vector<16x128xf32>
    %186 = tpu.matmul %183, %185, %cst_73 {dimension_numbers = #tpu.dot_dimension_numbers<[1], [0], [0], [1], [0, 0, 1, 1], [], []>} : vector<16x256xbf16>, vector<256x128xbf16>, vector<16x128xf32> -> vector<16x128xf32>
    %c0_74 = arith.constant 0 : index
    %c0_75 = arith.constant 0 : index
    %c0_76 = arith.constant 0 : index
    %187 = vector.load %arg20[%c0_74, %c0_75, %c0_76] : memref<1x1x128xf32, #tpu.memory_space<vmem>>, vector<1x1x128xf32>
    %188 = vector.shape_cast %187 : vector<1x1x128xf32> to vector<1x128xf32>
    %189 = vector.broadcast %188 : vector<1x128xf32> to vector<16x128xf32>
    %190 = arith.addf %186, %189 : vector<16x128xf32>
    %191 = arith.addf %137, %190 : vector<16x128xf32>
    %c0_77 = arith.constant 0 : index
    %c0_78 = arith.constant 0 : index
    %192 = vector.load %arg28[%c0_77, %c0_78] : memref<16x128xf32, #tpu.memory_space<vmem>>, vector<16x128xf32>
    tpu.vector_store %arg28[%c0_77, %c0_78], %191 {strides = array<i32>} : memref<16x128xf32, #tpu.memory_space<vmem>>, vector<16x128xf32>,
    %c1_i32 = arith.constant 1 : i32
    %193 = arith.cmpi eq, %arg0, %c1_i32 : i32
    %194 = arith.extui %193 : i1 to i32
    %c0_i32_79 = arith.constant 0 : i32
    %195 = arith.cmpi ne, %194, %c0_i32_79 : i32
    scf.if %195 {
      %c0_80 = arith.constant 0 : index
      %c0_81 = arith.constant 0 : index
      %196 = vector.load %arg21[%c0_80, %c0_81] : memref<1x128xf32, #tpu.memory_space<vmem>>, vector<1x128xf32>
      %c0_82 = arith.constant 0 : index
      %c0_83 = arith.constant 0 : index
      %197 = vector.load %arg22[%c0_82, %c0_83] : memref<1x128xf32, #tpu.memory_space<vmem>>, vector<1x128xf32>
      %cst_84 = arith.constant dense<0.000000e+00> : vector<16xf32>
      %198 = vector.multi_reduction <add>, %191, %cst_84 [1] : vector<16x128xf32> to vector<16xf32>
      %199 = vector.shape_cast %198 : vector<16xf32> to vector<16x1xf32>
      %cst_85 = arith.constant 1.280000e+02 : f32
      %200 = vector.broadcast %cst_85 : f32 to vector<16x1xf32>
      %201 = arith.divf %199, %200 : vector<16x1xf32>
      %202 = vector.broadcast %201 : vector<16x1xf32> to vector<16x128xf32>
      %203 = arith.subf %191, %202 : vector<16x128xf32>
      %204 = arith.mulf %203, %203 : vector<16x128xf32>
      %cst_86 = arith.constant dense<0.000000e+00> : vector<16xf32>
      %205 = vector.multi_reduction <add>, %204, %cst_86 [1] : vector<16x128xf32> to vector<16xf32>
      %206 = vector.shape_cast %205 : vector<16xf32> to vector<16x1xf32>
      %cst_87 = arith.constant 1.280000e+02 : f32
      %207 = vector.broadcast %cst_87 : f32 to vector<16x1xf32>
      %208 = arith.divf %206, %207 : vector<16x1xf32>
      %cst_88 = arith.constant 9.99999997E-7 : f32
      %209 = vector.broadcast %cst_88 : f32 to vector<16x1xf32>
      %210 = arith.addf %208, %209 : vector<16x1xf32>
      %211 = math.rsqrt %210 : vector<16x1xf32>
      %212 = vector.broadcast %211 : vector<16x1xf32> to vector<16x128xf32>
      %213 = arith.mulf %203, %212 : vector<16x128xf32>
      %214 = vector.broadcast %196 : vector<1x128xf32> to vector<16x128xf32>
      %215 = arith.mulf %213, %214 : vector<16x128xf32>
      %216 = vector.broadcast %197 : vector<1x128xf32> to vector<16x128xf32>
      %217 = arith.addf %215, %216 : vector<16x128xf32>
      %c0_89 = arith.constant 0 : index
      %c0_90 = arith.constant 0 : index
      %218 = vector.load %arg26[%c0_89, %c0_90] : memref<16x128xf32, #tpu.memory_space<vmem>>, vector<16x128xf32>
      tpu.vector_store %arg26[%c0_89, %c0_90], %217 {strides = array<i32>} : memref<16x128xf32, #tpu.memory_space<vmem>>, vector<16x128xf32>,
      %c0_91 = arith.constant 0 : index
      %c0_92 = arith.constant 0 : index
      %219 = vector.load %arg6[%c0_91, %c0_92] : memref<2x16xf32, #tpu.memory_space<vmem>>, vector<2x16xf32>
      %cst_93 = arith.constant dense<0.000000e+00> : vector<2x128xf32>
      %220 = tpu.matmul %219, %217, %cst_93 {dimension_numbers = #tpu.dot_dimension_numbers<[1], [0], [0], [1], [0, 0, 1, 1], [], []>} : vector<2x16xf32>, vector<16x128xf32>, vector<2x128xf32> -> vector<2x128xf32>
      %c0_94 = arith.constant 0 : index
      %c0_95 = arith.constant 0 : index
      %221 = vector.load %arg23[%c0_94, %c0_95] : memref<1x128xf32, #tpu.memory_space<vmem>>, vector<1x128xf32>
      %c0_96 = arith.constant 0 : index
      %c0_97 = arith.constant 0 : index
      %222 = vector.load %arg24[%c0_96, %c0_97] : memref<1x128xf32, #tpu.memory_space<vmem>>, vector<1x128xf32>
      %cst_98 = arith.constant dense<0.000000e+00> : vector<128xf32>
      %223 = vector.multi_reduction <add>, %220, %cst_98 [0] : vector<2x128xf32> to vector<128xf32>
      %224 = vector.shape_cast %223 : vector<128xf32> to vector<1x128xf32>
      %cst_99 = arith.constant 2.000000e+00 : f32
      %225 = vector.broadcast %cst_99 : f32 to vector<1x128xf32>
      %226 = arith.divf %224, %225 : vector<1x128xf32>
      %227 = vector.broadcast %226 : vector<1x128xf32> to vector<2x128xf32>
      %228 = arith.subf %220, %227 : vector<2x128xf32>
      %229 = arith.mulf %228, %228 : vector<2x128xf32>
      %cst_100 = arith.constant dense<0.000000e+00> : vector<128xf32>
      %230 = vector.multi_reduction <add>, %229, %cst_100 [0] : vector<2x128xf32> to vector<128xf32>
      %231 = vector.shape_cast %230 : vector<128xf32> to vector<1x128xf32>
      %cst_101 = arith.constant 2.000000e+00 : f32
      %232 = vector.broadcast %cst_101 : f32 to vector<1x128xf32>
      %233 = arith.divf %231, %232 : vector<1x128xf32>
      %cst_102 = arith.constant 9.99999974E-6 : f32
      %234 = vector.broadcast %cst_102 : f32 to vector<1x128xf32>
      %235 = arith.addf %233, %234 : vector<1x128xf32>
      %236 = math.rsqrt %235 : vector<1x128xf32>
      %237 = vector.broadcast %236 : vector<1x128xf32> to vector<2x128xf32>
      %238 = arith.mulf %228, %237 : vector<2x128xf32>
      %239 = vector.broadcast %221 : vector<1x128xf32> to vector<2x128xf32>
      %240 = arith.mulf %238, %239 : vector<2x128xf32>
      %241 = vector.broadcast %222 : vector<1x128xf32> to vector<2x128xf32>
      %242 = arith.addf %240, %241 : vector<2x128xf32>
      %c0_103 = arith.constant 0 : index
      %c0_104 = arith.constant 0 : index
      %243 = vector.load %arg7[%c0_103, %c0_104] : memref<16x2xf32, #tpu.memory_space<vmem>>, vector<16x2xf32>
      %244 = arith.subf %242, %220 : vector<2x128xf32>
      %cst_105 = arith.constant dense<0.000000e+00> : vector<16x128xf32>
      %245 = tpu.matmul %243, %244, %cst_105 {dimension_numbers = #tpu.dot_dimension_numbers<[1], [0], [0], [1], [0, 0, 1, 1], [], []>} : vector<16x2xf32>, vector<2x128xf32>, vector<16x128xf32> -> vector<16x128xf32>
      %246 = arith.addf %217, %245 : vector<16x128xf32>
      %247 = arith.truncf %246 : vector<16x128xf32> to vector<16x128xbf16>
      %c0_106 = arith.constant 0 : index
      %c0_107 = arith.constant 0 : index
      %248 = vector.load %arg25[%c0_106, %c0_107] : memref<128x128xbf16, #tpu.memory_space<vmem>>, vector<128x128xbf16>
      %cst_108 = arith.constant dense<0.000000e+00> : vector<16x128xf32>
      %249 = tpu.matmul %247, %248, %cst_108 {dimension_numbers = #tpu.dot_dimension_numbers<[1], [0], [0], [1], [0, 0, 1, 1], [], []>} : vector<16x128xbf16>, vector<128x128xbf16>, vector<16x128xf32> -> vector<16x128xf32>
      %c0_109 = arith.constant 0 : index
      %c0_110 = arith.constant 0 : index
      %250 = vector.load %arg27[%c0_109, %c0_110] : memref<16x128xf32, #tpu.memory_space<vmem>>, vector<16x128xf32>
      tpu.vector_store %arg27[%c0_109, %c0_110], %249 {strides = array<i32>} : memref<16x128xf32, #tpu.memory_space<vmem>>, vector<16x128xf32>,
    } else {
    }
    return
  }
  func.func @transform_0(%arg0: i32) -> (i32, i32) {
    %c0_i32 = arith.constant 0 : i32
    %c0_i32_0 = arith.constant 0 : i32
    %c0_i32_1 = arith.constant 0 : i32
    return %c0_i32, %c0_i32_0 : i32, i32
  }
  func.func @transform_1(%arg0: i32) -> (i32, i32) {
    %c0_i32 = arith.constant 0 : i32
    %c0_i32_0 = arith.constant 0 : i32
    %c0_i32_1 = arith.constant 0 : i32
    return %c0_i32, %c0_i32_0 : i32, i32
  }
  func.func @transform_2(%arg0: i32) -> (i32, i32) {
    %c0_i32 = arith.constant 0 : i32
    %c0_i32_0 = arith.constant 0 : i32
    %c0_i32_1 = arith.constant 0 : i32
    return %c0_i32, %c0_i32_0 : i32, i32
  }
  func.func @transform_3(%arg0: i32) -> (i32, i32) {
    %c0_i32 = arith.constant 0 : i32
    %c0_i32_0 = arith.constant 0 : i32
    %c0_i32_1 = arith.constant 0 : i32
    return %c0_i32, %c0_i32_0 : i32, i32
  }
  func.func @transform_4(%arg0: i32) -> (i32, i32) {
    %c0_i32 = arith.constant 0 : i32
    %c0_i32_0 = arith.constant 0 : i32
    %c0_i32_1 = arith.constant 0 : i32
    return %c0_i32, %c0_i32_0 : i32, i32
  }
  func.func @transform_5(%arg0: i32) -> (i32, i32) {
    %c0_i32 = arith.constant 0 : i32
    %c0_i32_0 = arith.constant 0 : i32
    %c0_i32_1 = arith.constant 0 : i32
    return %c0_i32, %c0_i32_0 : i32, i32
  }
  func.func @transform_6(%arg0: i32) -> (i32, i32) {
    %c0_i32 = arith.constant 0 : i32
    %c0_i32_0 = arith.constant 0 : i32
    %c0_i32_1 = arith.constant 0 : i32
    return %c0_i32, %c0_i32_0 : i32, i32
  }
  func.func @transform_7(%arg0: i32) -> (i32, i32) {
    %c0_i32 = arith.constant 0 : i32
    %c0_i32_0 = arith.constant 0 : i32
    %c0_i32_1 = arith.constant 0 : i32
    return %c0_i32, %c0_i32_0 : i32, i32
  }
  func.func @transform_8(%arg0: i32) -> (i32, i32, i32) {
    %c0_i32 = arith.constant 0 : i32
    %c0_i32_0 = arith.constant 0 : i32
    %c0_i32_1 = arith.constant 0 : i32
    return %arg0, %c0_i32, %c0_i32_0 : i32, i32, i32
  }
  func.func @transform_9(%arg0: i32) -> (i32, i32, i32) {
    %c0_i32 = arith.constant 0 : i32
    %c0_i32_0 = arith.constant 0 : i32
    %c0_i32_1 = arith.constant 0 : i32
    return %arg0, %c0_i32, %c0_i32_0 : i32, i32, i32
  }
  func.func @transform_10(%arg0: i32) -> (i32, i32, i32) {
    %c0_i32 = arith.constant 0 : i32
    %c0_i32_0 = arith.constant 0 : i32
    %c0_i32_1 = arith.constant 0 : i32
    return %arg0, %c0_i32, %c0_i32_0 : i32, i32, i32
  }
  func.func @transform_11(%arg0: i32) -> (i32, i32, i32) {
    %c0_i32 = arith.constant 0 : i32
    %c0_i32_0 = arith.constant 0 : i32
    %c0_i32_1 = arith.constant 0 : i32
    return %arg0, %c0_i32, %c0_i32_0 : i32, i32, i32
  }
  func.func @transform_12(%arg0: i32) -> (i32, i32, i32) {
    %c0_i32 = arith.constant 0 : i32
    %c0_i32_0 = arith.constant 0 : i32
    %c0_i32_1 = arith.constant 0 : i32
    return %arg0, %c0_i32, %c0_i32_0 : i32, i32, i32
  }
  func.func @transform_13(%arg0: i32) -> (i32, i32, i32) {
    %c0_i32 = arith.constant 0 : i32
    %c0_i32_0 = arith.constant 0 : i32
    %c0_i32_1 = arith.constant 0 : i32
    return %arg0, %c0_i32, %c0_i32_0 : i32, i32, i32
  }
  func.func @transform_14(%arg0: i32) -> (i32, i32, i32) {
    %c0_i32 = arith.constant 0 : i32
    %c0_i32_0 = arith.constant 0 : i32
    %c0_i32_1 = arith.constant 0 : i32
    return %arg0, %c0_i32, %c0_i32_0 : i32, i32, i32
  }
  func.func @transform_15(%arg0: i32) -> (i32, i32, i32) {
    %c0_i32 = arith.constant 0 : i32
    %c0_i32_0 = arith.constant 0 : i32
    %c0_i32_1 = arith.constant 0 : i32
    return %arg0, %c0_i32, %c0_i32_0 : i32, i32, i32
  }
  func.func @transform_16(%arg0: i32) -> (i32, i32, i32) {
    %c0_i32 = arith.constant 0 : i32
    %c0_i32_0 = arith.constant 0 : i32
    %c0_i32_1 = arith.constant 0 : i32
    return %arg0, %c0_i32, %c0_i32_0 : i32, i32, i32
  }
  func.func @transform_17(%arg0: i32) -> (i32, i32, i32) {
    %c0_i32 = arith.constant 0 : i32
    %c0_i32_0 = arith.constant 0 : i32
    %c0_i32_1 = arith.constant 0 : i32
    return %arg0, %c0_i32, %c0_i32_0 : i32, i32, i32
  }
  func.func @transform_18(%arg0: i32) -> (i32, i32, i32) {
    %c0_i32 = arith.constant 0 : i32
    %c0_i32_0 = arith.constant 0 : i32
    %c0_i32_1 = arith.constant 0 : i32
    return %arg0, %c0_i32, %c0_i32_0 : i32, i32, i32
  }
  func.func @transform_19(%arg0: i32) -> (i32, i32, i32) {
    %c0_i32 = arith.constant 0 : i32
    %c0_i32_0 = arith.constant 0 : i32
    %c0_i32_1 = arith.constant 0 : i32
    return %arg0, %c0_i32, %c0_i32_0 : i32, i32, i32
  }
  func.func @transform_20(%arg0: i32) -> (i32, i32) {
    %c0_i32 = arith.constant 0 : i32
    %c0_i32_0 = arith.constant 0 : i32
    %c0_i32_1 = arith.constant 0 : i32
    return %c0_i32, %c0_i32_0 : i32, i32
  }
  func.func @transform_21(%arg0: i32) -> (i32, i32) {
    %c0_i32 = arith.constant 0 : i32
    %c0_i32_0 = arith.constant 0 : i32
    %c0_i32_1 = arith.constant 0 : i32
    return %c0_i32, %c0_i32_0 : i32, i32
  }
  func.func @transform_22(%arg0: i32) -> (i32, i32) {
    %c0_i32 = arith.constant 0 : i32
    %c0_i32_0 = arith.constant 0 : i32
    %c0_i32_1 = arith.constant 0 : i32
    return %c0_i32, %c0_i32_0 : i32, i32
  }
  func.func @transform_23(%arg0: i32) -> (i32, i32) {
    %c0_i32 = arith.constant 0 : i32
    %c0_i32_0 = arith.constant 0 : i32
    %c0_i32_1 = arith.constant 0 : i32
    return %c0_i32, %c0_i32_0 : i32, i32
  }
  func.func @transform_24(%arg0: i32) -> (i32, i32) {
    %c0_i32 = arith.constant 0 : i32
    %c0_i32_0 = arith.constant 0 : i32
    %c0_i32_1 = arith.constant 0 : i32
    return %c0_i32, %c0_i32_0 : i32, i32
  }
  func.func @transform_25(%arg0: i32) -> (i32, i32) {
    %c0_i32 = arith.constant 0 : i32
    %c0_i32_0 = arith.constant 0 : i32
    %c0_i32_1 = arith.constant 0 : i32
    return %c0_i32, %c0_i32_0 : i32, i32
  }
  func.func @transform_26(%arg0: i32) -> (i32, i32) {
    %c0_i32 = arith.constant 0 : i32
    %c0_i32_0 = arith.constant 0 : i32
    %c0_i32_1 = arith.constant 0 : i32
    return %c0_i32, %c0_i32_0 : i32, i32
  }
}

</mosaic_0001>

<bundles_post_ra>
// kernel: ctc_vit_forward.1
= control target key start
LH: loop header
LB: loop body
LE: loop exit
PB: predicated region body
PF: predicated region fallthrough
CT: control target
= control target key end

     0   :  { %s4738_s0 = inlined_call_operand.vmem [shape: bf16[8,768], index: 0, kind: input, shape index: {}]   ;;  %s4739_s1 = inlined_call_operand.vmem [shape: bf16[768,128], index: 1, kind: input, shape index: {}]   ;;  %s4740_s2 = inlined_call_operand.vmem [shape: f32[1,128], index: 2, kind: input, shape index: {}]   ;;  %s4741_s3 = inlined_call_operand.vmem [shape: f32[16,8], index: 3, kind: input, shape index: {}]   ;;  %s4742_s4 = inlined_call_operand.vmem [shape: f32[16,128], index: 4, kind: input, shape index: {}]   ;;  %s4743_s5 = inlined_call_operand.vmem [shape: f32[2,16], index: 5, kind: input, shape index: {}]   ;;  %s4744_s6 = inlined_call_operand.vmem [shape: f32[16,2], index: 6, kind: input, shape index: {}]   ;;  %s4745_s7 = inlined_call_operand.vmem [shape: f32[16,16], index: 7, kind: input, shape index: {}]   ;;  %s4746_s8 = inlined_call_operand.vmem [shape: f32[2,1,128], index: 8, kind: input, shape index: {}]   ;;  %s4747_s9 = inlined_call_operand.vmem [shape: f32[2,1,128], index: 9, kind: input, shape index: {}]   ;;  %s4748_s10 = inlined_call_operand.vmem [shape: bf16[2,128,384], index: 10, kind: input, shape index: {}]   ;;  %s4749_s11 = inlined_call_operand.vmem [shape: f32[2,1,128], index: 11, kind: input, shape index: {}]   ;;  %s4750_s12 = inlined_call_operand.vmem [shape: bf16[2,128,128], index: 12, kind: input, shape index: {}]   ;;  %s4751_s13 = inlined_call_operand.vmem [shape: f32[2,1,128], index: 13, kind: input, shape index: {}]   ;;  %s4752_s14 = inlined_call_operand.vmem [shape: f32[2,1,128], index: 14, kind: input, shape index: {}]   ;;  %s4753_s15 = inlined_call_operand.vmem [shape: f32[2,1,128], index: 15, kind: input, shape index: {}]   ;;  %s4754_s16 = inlined_call_operand.vmem [shape: bf16[2,128,256], index: 16, kind: input, shape index: {}]   ;;  %s4755_s17 = inlined_call_operand.vmem [shape: f32[2,1,256], index: 17, kind: input, shape index: {}]   ;;  %s4756_s18 = inlined_call_operand.hbm [shape: bf16[2,256,128], index: 18, kind: input, shape index: {}]   ;;  %s4757_s19 = inlined_call_operand.vmem [shape: f32[2,1,128], index: 19, kind: input, shape index: {}]   ;;  %s4758_s20 = inlined_call_operand.vmem [shape: f32[1,128], index: 20, kind: input, shape index: {}]   ;;  %s4759_s21 = inlined_call_operand.vmem [shape: f32[1,128], index: 21, kind: input, shape index: {}]   ;;  %s4760_s22 = inlined_call_operand.vmem [shape: f32[1,128], index: 22, kind: input, shape index: {}]   ;;  %s4761_s23 = inlined_call_operand.hbm [shape: f32[1,128], index: 23, kind: input, shape index: {}]   ;;  %s4762_s24 = inlined_call_operand.hbm [shape: bf16[128,128], index: 24, kind: input, shape index: {}]   ;;  %s4763_s25 = inlined_call_operand.vmem [shape: f32[16,128], index: 25, kind: output, shape index: {0}]   ;;  %s4764_s26 = inlined_call_operand.vmem [shape: f32[16,128], index: 26, kind: output, shape index: {1}]  }
   0x1   :  { %4775 = sst [smem:[#allocation12_spill]] %s4738_s0 }
   0x2   :  { %4776 = sst [smem:[#allocation13_spill]] %s4739_s1 }
   0x3   :  { %4777 = sst [smem:[#allocation14_spill]] %s4740_s2 }
   0x4   :  { %4778 = sst [smem:[#allocation15_spill]] %s4741_s3 }
   0x5   :  { %4779 = sst [smem:[#allocation16_spill]] %s4742_s4 }
   0x6   :  { %4780 = sst [smem:[#allocation17_spill]] %s4743_s5 }
   0x7   :  { %4781 = sst [smem:[#allocation18_spill]] %s4744_s6 }
   0x8   :  { %4782 = sst [smem:[#allocation19_spill]] %s4745_s7 }
   0x9   :  { %4783 = sst [smem:[#allocation20_spill]] %s4746_s8 }
   0xa   :  { %4784 = sst [smem:[#allocation21_spill]] %s4747_s9 }
   0xb   :  { %4785 = sst [smem:[#allocation22_spill]] %s4748_s10 }
   0xc   :  { %4786 = sst [smem:[#allocation23_spill]] %s4756_s18 }
   0xd   :  { %4787 = sst [smem:[#allocation24_spill]] %s4757_s19 }
   0xe   :  { %4788 = sst [smem:[#allocation25_spill]] %s4758_s20 }
   0xf   :  { %4789 = sst [smem:[#allocation26_spill]] %s4759_s21 }
  0x10   :  { %4790 = sst [smem:[#allocation27_spill]] %s4760_s22 }
  0x11   :  { %4791 = sst [smem:[#allocation28_spill]] %s4761_s23 }
  0x12   :  { %4792 = sst [smem:[#allocation29_spill]] %s4762_s24 }
  0x13   :  { %4793 = sst [smem:[#allocation30_spill]] %s4763_s25 }
  0x14   :  { %4794 = sst [smem:[#allocation31_spill]] %s4764_s26 }
  0x15   :  { %32 = vsyncpa [#allocation4], 0 }
  0x16   :  { %34 = vsyncpa [#allocation4 + $0x1], 0 }
  0x17   :  { %35 = vsyncpa [#allocation6], 0  ;;  %s4085_s27 = smov 0   ;;  %s4087_s3 = smov 0  }
  0x18   :  { %s4089_s7 = smov 0   ;;  %s4091_s28 = smov 0  }
  0x19 LB: > { %s4104_s8 = sadd.s32 4294967295, %s3939_s28   ;;  %s4107_s4 = sadd.s32 1, %s3939_s28   ;;  %s3939_s28 = sphi %s4091_s28, %s4829_s28   ;;  %s3935_s7 = sphi %s4089_s7, %s4833_s7   ;;  %s3931_s3 = sphi %s4087_s3, %s4832_s3   ;;  %s3927_s27 = sphi %s4085_s27, %s4831_s27  }
  0x1a   : > { %4795 = sst [smem:[#allocation10_spill]] %s4107_s4  ;;  %s473_s29 = ssub.s32 %s3939_s28, %s4107_s4 }
  0x1b   : > { %s476_s0 = sadd.s32 1, %s3935_s7  ;;  %p474_p0 = scmp.eq.s32.totalorder %s473_s29, 0 }
  0x1c   : > { %p483_p1 = scmp.ne.s32.totalorder %s3935_s7, %s3931_s3  ;;  %p484_p2 = scmp.eq.s32.totalorder %s3939_s28, 0 }
  0x1d   : > { %p489_p3 = scmp.ne.s32.totalorder %s3931_s3, %s3927_s27  ;;  %p490_p5 = scmp.eq.s32.totalorder %s4104_s8, 0 }
  0x1e   : > { %s4117_s9 = scalar_select %p474_p0, %s3935_s7, %s476_s0  }
  0x1f   : > { %p4119_p4 = por %p484_p2, %p483_p1  ;;  %p3020_p6 = scmp.ge.s32.totalorder %s3939_s28, 1 }
  0x20   : > { %4796 = sst [smem:[#allocation11_spill]] %s4117_s9  ;;  %p673_p7 = scmp.lt.s32.totalorder %s3939_s28, 3 }
  0x21   : > { %p4128_p8 = por %p490_p5, %p489_p3  ;;  %p3021_p9 = scmp.ne.s32.totalorder %s4104_s8, 0 }
  0x22   : > { %p4133_p10 = pnand %p3020_p6, %p673_p7  ;;  %s4800_s23 = sld [smem:[#allocation28_spill]] }
  0x23   : > { %s3941_s27 = smov [#allocation5]   ;;  %p3682_p13 = scmp.lt.s32.totalorder %s3939_s28, 2 }
  0x24   : > { %p3669_p11 = pneg %p4133_p10  ;;  %s720_s29 = sshll.u32 %s3941_s27, 4  ;;  %s721_s29 = int_to_ptr.vmem [resolvable:$true] %s720_s29 }
  0x25   : > { %s4801_s24 = sld [smem:[#allocation29_spill]]  ;;  %p4150_p0 = pnand %p3682_p13, %p4119_p4 }
  0x26   : > { %p3670_p12 = pnand %p3669_p11, %p490_p5  ;;  %s3942_s6 = smov [#allocation7]  }
  0x27   : > { %s3943_s26 = smov 64   ;;  %s3944_s27 = smov 4  }
  0x28   : > { %s718_s1 = sshll.u32 %s4800_s23, 4  ;;  %s731_s23 = sshll.u32 %s3942_s6, 4  ;;  %s719_s1 = int_to_ptr.hbm [resolvable:$true] %s718_s1  ;;  %s732_s23 = int_to_ptr.vmem [resolvable:$true] %s731_s23 }
  0x29   : > { %3672 = dma.hbm_to_vmem [thread:$0]  (!%p3670_p12), %s719_s1, 16, %s721_s29, [#allocation6]  }
  0x2a   : > { %s812_s22 = sand.u32 1, %s3935_s7   ;;  %s3535_s9 = sshll.u32 %s3939_s28, 7 }
  0x2b   : > { %s729_s4 = sshll.u32 %s4801_s24, 4  ;;  %s3024_s0 = sshll.u32 %s812_s22, 7  ;;  %s730_s4 = int_to_ptr.hbm [resolvable:$true] %s729_s4 }
  0x2c   : > { %3675 = dma.hbm_to_vmem [thread:$0]  (!%p3670_p12), %s730_s4, 1024, %s732_s23, [#allocation6], %s3943_s26, %s3943_s26, %s3944_s27  }
  0x2d   : > { %s4803_s18 = sld [smem:[#allocation23_spill]]  ;;  %s816_s1 = scalar_lea.vmem [#allocation3], %s3024_s0 }
  0x2e   : > { %s824_s29 = sshll.u32 %s816_s1, 4  ;;  %s813_s6 = scalar_lea.sflag [#allocation4], %s812_s22  ;;  %s825_s29 = int_to_ptr.vmem [resolvable:$true] %s824_s29 }
  0x2f   : > { %p3875_p2 = pneg %p4150_p0 }
  0x33   : > { %s821_s25 = scalar_lea.hbm %s4803_s18, %s3535_s9  ;;  %s3878_s4 = scalar_lea.hbm %s4803_s18, 256 }
  0x34   : > { %s822_s21 = sshll.u32 %s821_s25, 4  ;;  %s823_s21 = int_to_ptr.hbm [resolvable:$true] %s822_s21 }
  0x35   : > { %s3871_s20 = sshra.s32 %s823_s21, 4  ;;  %s3872_s20 = int_to_ptr.hbm [resolvable:$true] %s3871_s20 }
  0x36   : > { %s3873_s19 = scalar_lea.hbm %s3872_s20, 128  ;;  %p3879_p6 = scmp.lt.s32.totalorder %s3872_s20, %s4803_s18 }
  0x37   : > { %p3874_p1 = scmp.ne.s32.totalorder %s3872_s20, %s3873_s19  ;;  %p3880_p7 = scmp.lt.s32.totalorder %s3878_s4, %s3873_s19 }
  0x39   : > { %p3876_p3 = pnand %p3875_p2, %p3874_p1  ;;  %p3881_p11 = por %p3880_p7, %p3879_p6 }
  0x3b   : > { %p3877_p4 = pneg %p3876_p3 }
  0x3d   : > { %p3882_p12 = pnand %p3881_p11, %p3877_p4 }
  0x3f   : > { %3885 = shalt.err (!%p3882_p12)
}
  0x40   : > { %3679 = dma.hbm_to_vmem [thread:$0]  (!%p4150_p0), %s823_s21, 2048, %s825_s29, %s813_s6, %s3943_s26, %s3943_s26, %s3944_s27  }
  0x41   : > { %842 = sbr.rel (%p4133_p10) target bundleno = 3402 (0xd4a), region = 120  ;;  %s844_s22 = sand.u32 (!%p4133_p10), 1, %s3931_s3  }
  0x42   : > { %s3028_s25 = sshll.u32 (!%p4133_p10), %s844_s22, 7  ;;  %s845_s0 = scalar_lea.sflag (!%p4133_p10), [#allocation4], %s844_s22 }
  0x43   : > { %s4178_s30 = scalar_lea.vmem (!%p4133_p10), [#allocation3], %s3028_s25 }
  0x46   : > { %3918 = dma.done.wait (%p4128_p8), %s845_s0, 2048  }
  0x47   : > { %3920 = vsyncadd (%p4128_p8), %s845_s0, 4294965248 }
  0x48   : > { %3922 = dma.done.wait (%p490_p5), [#allocation6], 1040  }
  0x49   : > { %3924 = vsyncadd (%p490_p5), [#allocation6], 4294966256  ;;  %p963_p10 = scmp.lt.s32.totalorder %s4104_s8, 1  ;;  %s4806_s20 = sld [smem:[#allocation22_spill]] }
  0x4a   : > { %s4807_s26 = sld [smem:[#allocation24_spill]] }
  0x4b   : > { %s4190_s19 = scalar_select %p963_p10, %s4104_s8, 1 }
  0x4c   : > { %s4808_s23 = sld [smem:[#allocation13_spill]] (!%p3021_p9) }
  0x4d   : > { %s3658_s29 = smul.u32 192, %s4190_s19  ;;  %s3536_s4 = sshll.u32 %s4190_s19, 6 }
  0x4e   : > { %s4218_s5 = scalar_lea.vmem %s4750_s12, %s3536_s4  ;;  %s987_s6 = scalar_lea.vmem %s4752_s14, %s4190_s19 }
  0x4f   : > { %s4213_s21 = scalar_lea.vmem %s4806_s20, %s3658_s29  ;;  %s3537_s24 = sshll.u32 %s4190_s19, 7 }
  0x50   : > { %s3036_s9 = sshll.u32 %s4190_s19, 1  ;;  %s4233_s29 = scalar_lea.vmem %s4754_s16, %s3537_s24 }
  0x51   : > { %s4238_s2 = scalar_lea.vmem %s4755_s17, %s3036_s9  ;;  %s1002_s10 = scalar_lea.vmem %s4807_s26, %s4190_s19 }
  0x52   : > { %1007 = sbr.rel (%p3021_p9) target bundleno = 425 (0x1a9), region = 136  ;;  %s4809_s9 = sld [smem:[#allocation12_spill]] (!%p3021_p9) }
  0x53   : > { %s4810_s28 = sld [smem:[#allocation14_spill]] (!%p3021_p9) }
  0x54   : > { %s4811_s22 = sld [smem:[#allocation15_spill]] (!%p3021_p9) }
  0x55   : > { %s4812_s20 = sld [smem:[#allocation16_spill]] (!%p3021_p9) }
  0x57   : > { %v3545_v0 = vld [vmem:[%s4808_s23 + $0x38] sm:$0xff]  ;;  %v3544_v2 = vld [vmem:[%s4808_s23 + $0x30] sm:$0xff]  ;;  %v3543_v8 = vld [vmem:[%s4808_s23 + $0x28] sm:$0xff]  ;;  %vm1502_vm0 = vcmask 64512  }
  0x58   : > { %v3553_v1 = vld [vmem:[%s4808_s23 + $0x78] sm:$0xff]  ;;  %1420 = vmatpush.bf16.msra.mxu0 %v3545_v0  ;;  %v3552_v3 = vld [vmem:[%s4808_s23 + $0x70] sm:$0xff]  ;;  %v3551_v9 = vld [vmem:[%s4808_s23 + $0x68] sm:$0xff] }
  0x59   : > { %1433 = vmatpush.bf16.msra.mxu1 %v3553_v1  ;;  %v3561_v4 = vld [vmem:[%s4808_s23 + $0xb8] sm:$0xff]  ;;  %v3560_v6 = vld [vmem:[%s4808_s23 + $0xb0] sm:$0xff]  ;;  %v3559_v10 = vld [vmem:[%s4808_s23 + $0xa8] sm:$0xff] }
  0x5a   : > { %v3569_v5 = vld [vmem:[%s4808_s23 + $0xf8] sm:$0xff]  ;;  %1446 = vmatpush.bf16.msra.mxu2 %v3561_v4  ;;  %v3568_v7 = vld [vmem:[%s4808_s23 + $0xf0] sm:$0xff]  ;;  %v3567_v11 = vld [vmem:[%s4808_s23 + $0xe8] sm:$0xff] }
  0x5b   : > { %1459 = vmatpush.bf16.msra.mxu3 %v3569_v5  ;;  %v3542_v12 = vld [vmem:[%s4808_s23 + $0x20] sm:$0xff]  ;;  %v3541_v16 = vld [vmem:[%s4808_s23 + $0x18] sm:$0xff]  ;;  %v3540_v20 = vld [vmem:[%s4808_s23 + $0x10] sm:$0xff] }
  0x5c   : > { %1421 = vmatpush.bf16.msra.mxu0 %v3544_v2  ;;  %v3550_v13 = vld [vmem:[%s4808_s23 + $0x60] sm:$0xff]  ;;  %v3549_v17 = vld [vmem:[%s4808_s23 + $0x58] sm:$0xff]  ;;  %v3548_v21 = vld [vmem:[%s4808_s23 + $0x50] sm:$0xff] }
  0x5d   : > { %1434 = vmatpush.bf16.msra.mxu1 %v3552_v3  ;;  %v3558_v14 = vld [vmem:[%s4808_s23 + $0xa0] sm:$0xff]  ;;  %v3557_v18 = vld [vmem:[%s4808_s23 + $0x98] sm:$0xff]  ;;  %v3556_v22 = vld [vmem:[%s4808_s23 + $0x90] sm:$0xff] }
  0x5e   : > { %1447 = vmatpush.bf16.msra.mxu2 %v3560_v6  ;;  %v3566_v15 = vld [vmem:[%s4808_s23 + $0xe0] sm:$0xff]  ;;  %v3565_v19 = vld [vmem:[%s4808_s23 + $0xd8] sm:$0xff]  ;;  %v3564_v23 = vld [vmem:[%s4808_s23 + $0xd0] sm:$0xff] }
  0x5f   : > { %1460 = vmatpush.bf16.msra.mxu3 %v3568_v7  ;;  %v3539_v24 = vld [vmem:[%s4808_s23 + $0x8] sm:$0xff]  ;;  %v1008_v26 = vld [vmem:[%s4809_s9] sm:$0xff]  ;;  %v3577_v34 = vld [vmem:[%s4808_s23 + $0x138] sm:$0xff] }
  0x60   : > { %1422 = vmatpush.bf16.msra.mxu0 %v3543_v8  ;;  %v3547_v25 = vld [vmem:[%s4808_s23 + $0x48] sm:$0xff]  ;;  %v1114_v28 = vunpack.c.l.b16 %v1008_v26  ;;  %v1115_v30 = vunpack.c.h.b16 %v1008_v26  ;;  %v3538_v32 = vld [vmem:[%s4808_s23] sm:$0xff]  ;;  %v3585_v35 = vld [vmem:[%s4808_s23 + $0x178] sm:$0xff] }
  0x61   : > { %1435 = vmatpush.bf16.msra.mxu1 %v3551_v9  ;;  %v3555_v27 = vld [vmem:[%s4808_s23 + $0x88] sm:$0xff]  ;;  %v3546_v33 = vld [vmem:[%s4808_s23 + $0x40] sm:$0xff]  ;;  %v3576_v42 = vld [vmem:[%s4808_s23 + $0x130] sm:$0xff] }
  0x62   : > { %1448 = vmatpush.bf16.msra.mxu2 %v3559_v10  ;;  %v3563_v29 = vld [vmem:[%s4808_s23 + $0xc8] sm:$0xff]  ;;  %v3554_v36 = vld [vmem:[%s4808_s23 + $0x80] sm:$0xff]  ;;  %v1120_v38 = vpack.c.b16 %v1114_v28, %v1114_v28  ;;  %v1121_v39 = vpack.c.b16 %v1115_v30, %v1115_v30  ;;  %v3584_v43 = vld [vmem:[%s4808_s23 + $0x170] sm:$0xff] }
  0x63   : > { %1461 = vmatpush.bf16.msra.mxu3 %v3567_v11  ;;  %v1009_v31 = vld [vmem:[%s4809_s9 + $0x8] sm:$0xff]  ;;  %v3562_v41 = vld [vmem:[%s4808_s23 + $0xc0] sm:$0xff]  ;;  %v3573_v50 = vld [vmem:[%s4808_s23 + $0x118] sm:$0xff] }
  0x64   : > { %1423 = vmatpush.bf16.msra.mxu0 %v3542_v12  ;;  %v1116_v37 = vunpack.c.l.b16 %v1009_v31  ;;  %v1117_v40 = vunpack.c.h.b16 %v1009_v31  ;;  %v3575_v46 = vld [vmem:[%s4808_s23 + $0x128] sm:$0xff]  ;;  %v3574_v48 = vld [vmem:[%s4808_s23 + $0x120] sm:$0xff]  ;;  %v3581_v51 = vld [vmem:[%s4808_s23 + $0x158] sm:$0xff] }
  0x65   : > { %1436 = vmatpush.bf16.msra.mxu1 %v3550_v13  ;;  %v3583_v47 = vld [vmem:[%s4808_s23 + $0x168] sm:$0xff]  ;;  %v3582_v49 = vld [vmem:[%s4808_s23 + $0x160] sm:$0xff]  ;;  %v3572_v52 = vld [vmem:[%s4808_s23 + $0x110] sm:$0xff] }
  0x66   : > { %1449 = vmatpush.bf16.msra.mxu2 %v3558_v14  ;;  %v1122_v44 = vpack.c.b16 %v1116_v37, %v1116_v37  ;;  %v1123_v45 = vpack.c.b16 %v1117_v40, %v1117_v40  ;;  %v3580_v53 = vld [vmem:[%s4808_s23 + $0x150] sm:$0xff]  ;;  %v3571_v54 = vld [vmem:[%s4808_s23 + $0x108] sm:$0xff]  ;;  %v3570_v59 = vld [vmem:[%s4808_s23 + $0x100] sm:$0xff] }
  0x67   : > { %1462 = vmatpush.bf16.msra.mxu3 %v3566_v15  ;;  %v3579_v55 = vld [vmem:[%s4808_s23 + $0x148] sm:$0xff]  ;;  %v1010_v56 = vld [vmem:[%s4809_s9 + $0x10] sm:$0xff]  ;;  %v3578_v60 = vld [vmem:[%s4808_s23 + $0x140] sm:$0xff] }
  0x68   : > { %1424 = vmatpush.bf16.msra.mxu0 %v3541_v16  ;;  %v1118_v57 = vunpack.c.l.b16 %v1010_v56  ;;  %v1119_v58 = vunpack.c.h.b16 %v1010_v56  ;;  %v3726_v5 = vld [vmem:[%s4810_s28] ss:$0 sm:$0xff] }
  0x69   : > { %1437 = vmatpush.bf16.msra.mxu1 %v3549_v17  ;;  %v1498_v16 = vld [vmem:[%s4811_s22] sm:$0xff] }
  0x6a   : > { %1450 = vmatpush.bf16.msra.mxu2 %v3557_v18  ;;  %v1124_v61 = vpack.c.b16 %v1118_v57, %v1118_v57  ;;  %v1125_v62 = vpack.c.b16 %v1119_v58, %v1119_v58 }
  0x6b   : > { %1463 = vmatpush.bf16.msra.mxu3 %v3565_v19  ;;  %v1499_v19 = vld [vmem:[%s4811_s22 + $0x8] sm:$0xff] }
  0x6c   : > { %1425 = vmatpush.bf16.msra.mxu0 %v3540_v20  ;;  %v1500_v20 = vld [vmem:[%s4812_s20] sm:$0xff] }
  0x6d   : > { %1438 = vmatpush.bf16.msra.mxu1 %v3548_v21 }
  0x6e   : > { %1451 = vmatpush.bf16.msra.mxu2 %v3556_v22 }
  0x6f   : > { %1464 = vmatpush.bf16.msra.mxu3 %v3564_v23  ;;  %v1501_v23 = vld [vmem:[%s4812_s20 + $0x8] sm:$0xff] }
  0x70   : > { %1426 = vmatpush.bf16.msra.mxu0 %v3539_v24 }
  0x71   : > { %1439 = vmatpush.bf16.msra.mxu1 %v3547_v25 }
  0x72   : > { %1452 = vmatpush.bf16.msra.mxu2 %v3555_v27 }
  0x73   : > { %1465 = vmatpush.bf16.msra.mxu3 %v3563_v29 }
  0x74   : > { %1427 = vmatpush.bf16.msra.mxu0 %v3538_v32 }
  0x75   : > { %1440 = vmatpush.bf16.msra.mxu1 %v3546_v33 }
  0x76   : > { %1453 = vmatpush.bf16.msra.mxu2 %v3554_v36 }
  0x77   : > { %1428 = vmatmul.bf16.vlgmr.msra.gmra.mxu0 %v1120_v38  ;;  %1466 = vmatpush.bf16.msra.mxu3 %v3562_v41 }
  0x78   : > { %1472 = vmatpush.bf16.msrb.mxu0 %v3577_v34  ;;  %1441 = vmatmul.bf16.vlgmr.msra.gmra.mxu1 %v1121_v39 }
  0x79   : > { %1485 = vmatpush.bf16.msrb.mxu1 %v3585_v35  ;;  %1454 = vmatmul.bf16.vlgmr.msra.gmra.mxu2 %v1122_v44 }
  0x7a   : > { %1467 = vmatmul.bf16.vlgmr.msra.gmra.mxu3 %v1123_v45 }
  0x7c   : > { %1473 = vmatpush.bf16.msrb.mxu0 %v3576_v42 }
  0x7d   : > { %1486 = vmatpush.bf16.msrb.mxu1 %v3584_v43 }
  0x80   : > { %1474 = vmatpush.bf16.msrb.mxu0 %v3575_v46 }
  0x81   : > { %1487 = vmatpush.bf16.msrb.mxu1 %v3583_v47 }
  0x84   : > { %1475 = vmatpush.bf16.msrb.mxu0 %v3574_v48 }
  0x85   : > { %1488 = vmatpush.bf16.msrb.mxu1 %v3582_v49 }
  0x88   : > { %1476 = vmatpush.bf16.msrb.mxu0 %v3573_v50 }
  0x89   : > { %1489 = vmatpush.bf16.msrb.mxu1 %v3581_v51 }
  0x8c   : > { %1477 = vmatpush.bf16.msrb.mxu0 %v3572_v52 }
  0x8d   : > { %1490 = vmatpush.bf16.msrb.mxu1 %v3580_v53 }
  0x90   : > { %1478 = vmatpush.bf16.msrb.mxu0 %v3571_v54 }
  0x91   : > { %1491 = vmatpush.bf16.msrb.mxu1 %v3579_v55 }
  0x94   : > { %1479 = vmatpush.bf16.msrb.mxu0 %v3570_v59 }
  0x95   : > { %1492 = vmatpush.bf16.msrb.mxu1 %v3578_v60 }
  0x97   : > { %1480 = vmatmul.bf16.vlgmr.msrb.gmra.mxu0 %v1124_v61 }
  0x98   : > { %1493 = vmatmul.bf16.vlgmr.msrb.gmra.mxu1 %v1125_v62 }
  0xf4   : > { %v1429_v63 = vpop.f32.mrf.mxu0 }
  0xf5   : > { %v1442_v0 = vpop.f32.mrf.mxu1  ;;  %v1430_v6 = vadd.f32 %v3726_v5, %v1429_v63 }
  0xf7   : > { %v1443_v9 = vadd.f32 %v1442_v0, %v1430_v6 }
  0xfc   : > { %v1431_v1 = vpop.f32.mrf.mxu0  ;;  %v1455_v3 = vpop.f32.mrf.mxu2 }
  0xfd   : > { %v1444_v2 = vpop.f32.mrf.mxu1  ;;  %v1468_v4 = vpop.f32.mrf.mxu3  ;;  %v1456_v10 = vadd.f32 %v1455_v3, %v1443_v9 }
  0xff   : > { %v1469_v11 = vadd.f32 %v1468_v4, %v1456_v10 }
 0x104   : > { %v1457_v7 = vpop.f32.mrf.mxu2 }
 0x105   : > { %v1470_v8 = vpop.f32.mrf.mxu3 }
 0x114   : > { %v1481_v12 = vpop.f32.mrf.mxu0 }
 0x115   : > { %v1494_v13 = vpop.f32.mrf.mxu1  ;;  %v1482_v14 = vadd.f32 %v1481_v12, %v1469_v11 }
 0x117   : > { %v1495_v15 = vadd.f32 %v1494_v13, %v1482_v14 }
 0x119   : > { %1524 = vmatpush.msrb.mxu2 %v1495_v15 }
 0x11a   : > { %3230 = vmatmul.msk.f32.vlgmr.msrb.gmra.mxu2 %vm1502_vm0, %v1498_v16 }
 0x11c   : > { %v1483_v17 = vpop.f32.mrf.mxu0 }
 0x11d   : > { %v1496_v18 = vpop.f32.mrf.mxu1 }
 0x122   : > { %3231 = vmatmul.msk.f32.gmra.mxu2 %vm1502_vm0, %v1499_v19 }
 0x19d   : > { %v1526_v21 = vpop.f32.mrf.mxu2 }
 0x19e   : > { %v1527_v22 = vadd.f32 %v1526_v21, %v1500_v20 }
 0x1a0   : > { %1532 = vst [vmem:[#allocation2] sm:$0xff] %v1527_v22 }
 0x1a5   : > { %v1529_v24 = vpop.f32.mrf.mxu2 }
 0x1a6   : > { %v1530_v25 = vadd.f32 %v1529_v24, %v1501_v23 }
 0x1a8   : > { %1533 = vst [vmem:[#allocation2 + $0x8] sm:$0xff] %v1530_v25 }
 0x1a9 PF: > { %v4414_v26 = vld [vmem:[#allocation2] sm:$0xff]  ;;  %v3945_v28 = vmov 128.0   ;;  %v3318_v43 = vld [vmem:[%s4213_s21 + $0xa8] sm:$0xf]  ;;  %v3608_v44 = vld [vmem:[%s4213_s21 + $0xb0] sm:$0xf0]  ;;  %s4820_s25 = scalar_lea.vmem %s4753_s15, %s4190_s19 }
 0x1aa   : > { %1538 = vadd.xlane.f32.xlu0 %v4414_v26  ;;  %3749 = vrcp.f32 %v3945_v28  ;;  %v3607_v45 = vld [vmem:[%s4213_s21 + $0xac] sm:$0xf]  ;;  %v3319_v46 = vor.u32 %v3608_v44, %v3318_v43  ;;  %v3320_v47 = vld [vmem:[%s4213_s21 + $0xb4] sm:$0xf0]  ;;  %v3326_v48 = vld [vmem:[%s4213_s21 + $0xb0] sm:$0xf] }
 0x1ab   : > { %v3609_v49 = vld [vmem:[%s4213_s21 + $0xb8] sm:$0xf0]  ;;  %v3323_v50 = vor.u32 %v3607_v45, %v3320_v47  ;;  %v3306_v52 = vld [vmem:[%s4213_s21 + $0x90] sm:$0xf]  ;;  %v3604_v54 = vld [vmem:[%s4213_s21 + $0x94] sm:$0xf] }
 0x1ac   : > { %v3327_v51 = vor.u32 %v3609_v49, %v3326_v48  ;;  %1756 = vmatpush.bf16.msra.mxu0 %v3319_v46  ;;  %v3605_v53 = vld [vmem:[%s4213_s21 + $0x98] sm:$0xf0]  ;;  %v3308_v56 = vld [vmem:[%s4213_s21 + $0x9c] sm:$0xf0]  ;;  %v3314_v57 = vld [vmem:[%s4213_s21 + $0x98] sm:$0xf] }
 0x1ad   : > { %1770 = vmatpush.bf16.msra.mxu1 %v3323_v50  ;;  %v3307_v55 = vor.u32 %v3605_v53, %v3306_v52  ;;  %v3606_v58 = vld [vmem:[%s4213_s21 + $0xa0] sm:$0xf0]  ;;  %v3311_v59 = vor.u32 %v3604_v54, %v3308_v56  ;;  %v3294_v61 = vld [vmem:[%s4213_s21 + $0x78] sm:$0xf]  ;;  %v3601_v63 = vld [vmem:[%s4213_s21 + $0x7c] sm:$0xf] }
 0x1ae   : > { %1784 = vmatpush.bf16.msra.mxu2 %v3327_v51  ;;  %v3315_v60 = vor.u32 %v3606_v58, %v3314_v57  ;;  %v3602_v62 = vld [vmem:[%s4213_s21 + $0x80] sm:$0xf0]  ;;  %v3296_v1 = vld [vmem:[%s4213_s21 + $0x84] sm:$0xf0]  ;;  %v3302_v2 = vld [vmem:[%s4213_s21 + $0x80] sm:$0xf] }
 0x1af   : > { %v4417_v27 = vld [vmem:[#allocation2 + $0x8] sm:$0xff]  ;;  %v3295_v0 = vor.u32 %v3602_v62, %v3294_v61  ;;  %v3299_v4 = vor.u32 %v3601_v63, %v3296_v1  ;;  %v3282_v6 = vld [vmem:[%s4213_s21 + $0x60] sm:$0xf]  ;;  %v3598_v8 = vld [vmem:[%s4213_s21 + $0x64] sm:$0xf]  ;;  %s4813_s27 = sld [smem:[#allocation20_spill]] }
 0x1b0   : > { %v3750_v29 = vpop.eup %3749  ;;  %1757 = vmatpush.bf16.msra.mxu0 %v3307_v55  ;;  %v3603_v3 = vld [vmem:[%s4213_s21 + $0x88] sm:$0xf0]  ;;  %v3284_v10 = vld [vmem:[%s4213_s21 + $0x6c] sm:$0xf0]  ;;  %v3290_v11 = vld [vmem:[%s4213_s21 + $0x68] sm:$0xf] }
 0x1b1   : > { %v1543_v30 = vmul.f32 128.0, %v3750_v29  ;;  %vm1547_vm1 = vweird.f32 %v3750_v29  ;;  %1771 = vmatpush.bf16.msra.mxu1 %v3311_v59  ;;  %v3303_v5 = vor.u32 %v3603_v3, %v3302_v2  ;;  %v3599_v7 = vld [vmem:[%s4213_s21 + $0x68] sm:$0xf0]  ;;  %v3600_v12 = vld [vmem:[%s4213_s21 + $0x70] sm:$0xf0]  ;;  %v3287_v13 = vor.u32 %v3598_v8, %v3284_v10  ;;  %s4815_s0 = sld [smem:[#allocation21_spill]] }
 0x1b2   : > { %1540 = vadd.xlane.f32.xlu0 %v4417_v27  ;;  %1785 = vmatpush.bf16.msra.mxu2 %v3315_v60  ;;  %v3283_v9 = vor.u32 %v3599_v7, %v3282_v6  ;;  %v3291_v14 = vor.u32 %v3600_v12, %v3290_v11  ;;  %v3270_v15 = vld [vmem:[%s4213_s21 + $0x48] sm:$0xf]  ;;  %v3596_v16 = vld [vmem:[%s4213_s21 + $0x50] sm:$0xf0]  ;;  %v3595_v17 = vld [vmem:[%s4213_s21 + $0x4c] sm:$0xf] }
 0x1b3   : > { %v1544_v31 = vsub.f32 1.0, %v1543_v30  ;;  %v3271_v18 = vor.u32 %v3596_v16, %v3270_v15  ;;  %v3272_v19 = vld [vmem:[%s4213_s21 + $0x54] sm:$0xf0]  ;;  %v3278_v20 = vld [vmem:[%s4213_s21 + $0x50] sm:$0xf]  ;;  %vm1809_vm8 = vcmask 261120  }
 0x1b4   : > { %1758 = vmatpush.bf16.msra.mxu0 %v3295_v0  ;;  %v3597_v21 = vld [vmem:[%s4213_s21 + $0x58] sm:$0xf0]  ;;  %v3275_v22 = vor.u32 %v3595_v17, %v3272_v19  ;;  %v3258_v24 = vld [vmem:[%s4213_s21 + $0x30] sm:$0xf]  ;;  %v3592_v28 = vld [vmem:[%s4213_s21 + $0x34] sm:$0xf] }
 0x1b5   : > { %v1545_v32 = vmul.f32 %v3750_v29, %v1544_v31  ;;  %1772 = vmatpush.bf16.msra.mxu1 %v3299_v4  ;;  %v3279_v23 = vor.u32 %v3597_v21, %v3278_v20  ;;  %v3593_v25 = vld [vmem:[%s4213_s21 + $0x38] sm:$0xf0]  ;;  %v3260_v30 = vld [vmem:[%s4213_s21 + $0x3c] sm:$0xf0]  ;;  %v3266_v31 = vld [vmem:[%s4213_s21 + $0x38] sm:$0xf]  ;;  %s4814_s18 = scalar_lea.vmem %s4813_s27, %s4190_s19 }
 0x1b6   : > { %1786 = vmatpush.bf16.msra.mxu2 %v3303_v5  ;;  %v3254_v43 = vld [vmem:[%s4213_s21 + $0x20] sm:$0xf]  ;;  %v3591_v44 = vld [vmem:[%s4213_s21 + $0x28] sm:$0xf0]  ;;  %v3586_v49 = vld [vmem:[%s4213_s21 + $0x4] sm:$0xf] }
 0x1b7   : > { %v1546_v33 = vadd.f32 %v3750_v29, %v1545_v32  ;;  %v3594_v32 = vld [vmem:[%s4213_s21 + $0x40] sm:$0xf0]  ;;  %v3255_v46 = vor.u32 %v3591_v44, %v3254_v43  ;;  %v3234_v47 = vld [vmem:[%s4213_s21] sm:$0xf]  ;;  %v3587_v48 = vld [vmem:[%s4213_s21 + $0x8] sm:$0xf0]  ;;  %s4816_s4 = scalar_lea.vmem %s4815_s0, %s4190_s19 }
 0x1b8   : > { %1759 = vmatpush.bf16.msra.mxu0 %v3283_v9  ;;  %v3235_v51 = vor.u32 %v3587_v48, %v3234_v47  ;;  %v3236_v52 = vld [vmem:[%s4213_s21 + $0xc] sm:$0xf0]  ;;  %v3242_v53 = vld [vmem:[%s4213_s21 + $0x8] sm:$0xf]  ;;  %v3588_v54 = vld [vmem:[%s4213_s21 + $0x10] sm:$0xf0] }
 0x1b9   : > { %v4420_v34 = vsel %vm1547_vm1, %v3750_v29, %v1546_v33  ;;  %1773 = vmatpush.bf16.msra.mxu1 %v3287_v13  ;;  %v3259_v29 = vor.u32 %v3593_v25, %v3258_v24  ;;  %v3263_v33 = vor.u32 %v3592_v28, %v3260_v30  ;;  %v3239_v56 = vor.u32 %v3586_v49, %v3236_v52  ;;  %v3742_v11 = vld [vmem:[%s4814_s18] ss:$0 sm:$0xff]  ;;  %s3946_s28 = smov 96   ;;  %s4818_s24 = sld [smem:[#allocation19_spill]] }
 0x1ba   : > { %1787 = vmatpush.bf16.msra.mxu2 %v3291_v14  ;;  %v3243_v57 = vor.u32 %v3588_v54, %v3242_v53  ;;  %v3743_v16 = vld [vmem:[%s4816_s4] ss:$0 sm:$0xff]  ;;  %vm1834_vm9 = vcmask 130048   ;;  %s3947_s4 = smov 32   ;;  %s3948_s26 = smov 64   ;;  %vm2117_vm10 = vcmask 523264  }
 0x1bb   : > { %vm2120_vm11 = vcmask 785408   ;;  %p3496_p5 = scmp.ne.s32.totalorder %s4104_s8, 1 }
 0x1bc   : > { %1760 = vmatpush.bf16.msra.mxu0 %v3271_v18  ;;  %s4825_s27 = sld [smem:[#allocation17_spill]] (!%p3496_p5) }
 0x1bd   : > { %1774 = vmatpush.bf16.msra.mxu1 %v3275_v22  ;;  %s4828_s1 = sld [smem:[#allocation31_spill]] (!%p3496_p5) }
 0x1be   : > { %1788 = vmatpush.bf16.msra.mxu2 %v3279_v23 }
 0x1bf   : > { %v4517_v43 = vld [vmem:[%s4818_s24 + $0x8] sm:$0xff] }
 0x1c0   : > { %1761 = vmatpush.bf16.msra.mxu0 %v3259_v29 }
 0x1c1   : > { %1775 = vmatpush.bf16.msra.mxu1 %v3263_v33 }
 0x21d   : > { %v1539_v35 = vpop.xlane.xlu0 %1538 }
 0x21e   : > { %v1549_v36 = vmul.f32 %v4420_v34, %v1539_v35  ;;  %v3267_v35 = vor.u32 %v3594_v32, %v3266_v31 }
 0x220   : > { %v4424_v37 = vsub.f32 %v4414_v26, %v1549_v36  ;;  %1789 = vmatpush.bf16.msra.mxu2 %v3267_v35  ;;  %v3246_v36 = vld [vmem:[%s4213_s21 + $0x18] sm:$0xf] }
 0x222   : > { %v1553_v38 = vmul.f32 %v4424_v37, %v4424_v37 }
 0x224   : > { %1555 = vadd.xlane.f32.xlu1 %v1553_v38  ;;  %v3590_v38 = vld [vmem:[%s4213_s21 + $0x20] sm:$0xf0]  ;;  %1790 = vmatpush.bf16.msra.mxu2 %v3255_v46 }
 0x225   : > { %v1541_v39 = vpop.xlane.xlu0 %1540 }
 0x226   : > { %v1550_v40 = vmul.f32 %v4420_v34, %v1541_v39  ;;  %v3589_v39 = vld [vmem:[%s4213_s21 + $0x1c] sm:$0xf] }
 0x228   : > { %v4430_v41 = vsub.f32 %v4417_v27, %v1550_v40  ;;  %v3247_v40 = vor.u32 %v3590_v38, %v3246_v36  ;;  %1791 = vmatpush.bf16.msra.mxu2 %v3243_v57  ;;  %v4510_v36 = vld [vmem:[%s4818_s24] sm:$0xff] }
 0x22a   : > { %v1554_v42 = vmul.f32 %v4430_v41, %v4430_v41  ;;  %1762 = vmatpush.bf16.msra.mxu0 %v3247_v40 }
 0x22c   : > { %1557 = vadd.xlane.f32.xlu1 %v1554_v42  ;;  %v3248_v42 = vld [vmem:[%s4213_s21 + $0x24] sm:$0xf0]  ;;  %s4817_s21 = scalar_lea.vmem %s4749_s11, %s4190_s19 }
 0x22d   : > { %v3251_v45 = vor.u32 %v3589_v39, %v3248_v42 }
 0x22e   : > { %1763 = vmatpush.bf16.msra.mxu0 %v3235_v51 }
 0x22f   : > { %1776 = vmatpush.bf16.msra.mxu1 %v3251_v45 }
 0x233   : > { %1777 = vmatpush.bf16.msra.mxu1 %v3239_v56 }
 0x297   : > { %v1556_v50 = vpop.xlane.xlu1 %1555 }
 0x298   : > { %v1559_v55 = vmul.f32 %v1556_v50, %v4420_v34 }
 0x29a   : > { %v1561_v58 = vadd.f32 1e-06, %v1559_v55 }
 0x29c   : > { %3751 = vrsqrt.f32 %v1561_v58  ;;  %vm1569_vm3 = vweird.f32 %v1561_v58 }
 0x29f   : > { %v1558_v59 = vpop.xlane.xlu1 %1557 }
 0x2a0   : > { %v1560_v60 = vmul.f32 %v1558_v59, %v4420_v34 }
 0x2a2   : > { %v3752_v61 = vpop.eup %3751  ;;  %v1562_v62 = vadd.f32 1e-06, %v1560_v60 }
 0x2a3   : > { %v1564_v63 = vmul.f32 %v3752_v61, %v1561_v58  ;;  %vm1570_vm2 = vweird.f32 %v3752_v61 }
 0x2a4   : > { %3753 = vrsqrt.f32 %v1562_v62  ;;  %vm1571_vm4 = vmor %vm1569_vm3, %vm1570_vm2  ;;  %vm1579_vm6 = vweird.f32 %v1562_v62 }
 0x2a5   : > { %v1565_v0 = vmul.f32 %v3752_v61, %v1564_v63 }
 0x2a7   : > { %v1566_v1 = vmul.f32 0.5, %v1565_v0 }
 0x2a9   : > { %v1567_v2 = vsub.f32 1.5, %v1566_v1 }
 0x2aa   : > { %v3754_v3 = vpop.eup %3753 }
 0x2ab   : > { %v1568_v4 = vmul.f32 %v3752_v61, %v1567_v2  ;;  %v1574_v5 = vmul.f32 %v3754_v3, %v1562_v62  ;;  %vm1580_vm5 = vweird.f32 %v3754_v3 }
 0x2ac   : > { %vm1581_vm7 = vmor %vm1579_vm6, %vm1580_vm5 }
 0x2ad   : > { %v1575_v6 = vmul.f32 %v3754_v3, %v1574_v5  ;;  %v1572_v7 = vsel %vm1571_vm4, %v3752_v61, %v1568_v4 }
 0x2ae   : > { %v1583_v10 = vmul.f32 %v1572_v7, %v4424_v37 }
 0x2af   : > { %v1576_v8 = vmul.f32 0.5, %v1575_v6 }
 0x2b0   : > { %v1588_v15 = vmul.f32 %v3742_v11, %v1583_v10 }
 0x2b1   : > { %v1577_v9 = vsub.f32 1.5, %v1576_v8 }
 0x2b2   : > { %v1593_v37 = vadd.f32 %v3743_v16, %v1588_v15 }
 0x2b3   : > { %v1578_v12 = vmul.f32 %v3754_v3, %v1577_v9 }
 0x2b5   : > { %v1582_v13 = vsel %vm1581_vm7, %v3754_v3, %v1578_v12 }
 0x2b6   : > { %v1584_v14 = vmul.f32 %v1582_v13, %v4430_v41  ;;  %v3744_v41 = vld [vmem:[%s4817_s21] ss:$0 sm:$0xff]  ;;  %s4819_s21 = scalar_lea.vmem %s4751_s13, %s4190_s19 }
 0x2b8   : > { %v1589_v17 = vmul.f32 %v3742_v11, %v1584_v14 }
 0x2ba   : > { %v1594_v18 = vadd.f32 %v3743_v16, %v1589_v17 }
 0x2bc   : > { %v1595_v19 = vpack.c.bf16 %v1594_v18, %v1593_v37 }
 0x2be   : > { %1764 = vmatmul.bf16.vlgmr.msra.gmra.mxu0 %v1595_v19  ;;  %1778 = vmatmul.bf16.vlgmr.msra.gmra.mxu1 %v1595_v19 }
 0x2bf   : > { %1792 = vmatmul.bf16.vlgmr.msra.gmra.mxu2 %v1595_v19 }
 0x33b   : > { %v1765_v20 = vpop.f32.mrf.mxu0  ;;  %v1779_v21 = vpop.f32.mrf.mxu1 }
 0x33c   : > { %v1802_v25 = vadd.f32 %v3744_v41, %v1765_v20 }
 0x342   : > { %v1793_v22 = vpop.f32.mrf.mxu2 }
 0x343   : > { %v1767_v23 = vpop.f32.mrf.mxu0  ;;  %v1781_v24 = vpop.f32.mrf.mxu1 }
 0x344   : > { %v1803_v28 = vadd.f32 %v3744_v41, %v1767_v23  ;;  %v1807_v29 = vpack.c.bf16 %v1781_v24, %v1779_v21 }
 0x346   : > { %v1806_v30 = vpack.c.bf16 %v1803_v28, %v1802_v25  ;;  %v1814_v31 = vsel %vm1809_vm8, %v1807_v29, 0 }
 0x347   : > { %1823 = vmatpush.bf16.xpose.msra.mxu3 %v1814_v31 }
 0x348   : > { %1876 = vrot.lane.b32.xlu0 %v1806_v30, %s3946_s28 }
 0x34a   : > { %v1795_v32 = vpop.f32.mrf.mxu2 }
 0x34b   : > { %v4503_v33 = vpack.c.bf16 %v1795_v32, %v1793_v22 }
 0x34e   : > { %3328 = vmatmul.msk.bf16.vlgmr.msra.gmra.mxu3 %vm1809_vm8, %v1806_v30 }
 0x34f   : > { %1868 = vmatpush.bf16.msrb.mxu3 %v4503_v33 }
 0x3ba   : > { %v1877_v59 = vpop.permute.xlu0 %1876 }
 0x3d1   : > { %v1825_v35 = vpop.f32.mrf.mxu3 }
 0x3d2   : > { %v1830_v38 = vmul.f32 0.17677669, %v1825_v35 }
 0x3d4   : > { %v1832_v39 = vadd.f32 %v1830_v38, %v4510_v36 }
 0x3d6   : > { %v1835_v40 = vsel %vm1834_vm9, %v1832_v39, -inf }
 0x3d7   : > { %1836 = vmax.xlane.f32.xlu2 %v1835_v40 }
 0x3d9   : > { %v1827_v42 = vpop.f32.mrf.mxu3 }
 0x3da   : > { %v1831_v44 = vmul.f32 0.17677669, %v1827_v42 }
 0x3dc   : > { %v1833_v45 = vadd.f32 %v1831_v44, %v4517_v43 }
 0x3de   : > { %v1838_v46 = vsel %vm1834_vm9, %v1833_v45, -inf }
 0x3df   : > { %1839 = vmax.xlane.f32.xlu2 %v1838_v46 }
 0x3f7   : > { %1879 = vrot.lane.b32.xlu2 %v1807_v29, %s3946_s28 }
 0x3ff   : > { %2022 = vrot.lane.b32.xlu2 %v1807_v29, %s3947_s4 }
 0x407   : > { %2020 = vrot.lane.b32.xlu2 %v1806_v30, %s3947_s4 }
 0x44a   : > { %v1837_v47 = vpop.xlane.xlu2 %1836 }
 0x44b   : > { %v1841_v48 = vsub.f32 %v1832_v39, %v1837_v47 }
 0x44d   : > { %v1843_v49 = vmul.f32 1.442695, %v1841_v48 }
 0x44f   : > { %3755 = vpow2.f32 %v1843_v49 }
 0x452   : > { %v1840_v50 = vpop.xlane.xlu2 %1839 }
 0x453   : > { %v1842_v51 = vsub.f32 %v1833_v45, %v1840_v50 }
 0x455   : > { %v3756_v52 = vpop.eup %3755  ;;  %v1845_v53 = vmul.f32 1.442695, %v1842_v51 }
 0x456   : > { %v1847_v54 = vsel %vm1834_vm9, %v3756_v52, 0.0 }
 0x457   : > { %3757 = vpow2.f32 %v1845_v53  ;;  %1848 = vadd.xlane.f32.xlu0 %v1847_v54 }
 0x45a   : > { %v1880_v55 = vpop.permute.xlu2 %1879 }
 0x45b   : > { %v1885_v56 = vsel %vm1809_vm8, %v1880_v55, 0 }
 0x45c   : > { %1894 = vmatpush.bf16.xpose.msra.mxu3 %v1885_v56 }
 0x45d   : > { %v3758_v57 = vpop.eup %3757 }
 0x45e   : > { %v1850_v58 = vsel %vm1834_vm9, %v3758_v57, 0.0 }
 0x45f   : > { %1851 = vadd.xlane.f32.xlu1 %v1850_v58 }
 0x462   : > { %v2023_v2 = vpop.permute.xlu2 %2022 }
 0x463   : > { %v2028_v4 = vsel %vm1809_vm8, %v2023_v2, 0 }
 0x46a   : > { %v2021_v8 = vpop.permute.xlu2 %2020 }
 0x46b   : > { %1949 = vrot.lane.b32.xlu0 %v1806_v30, %s3948_s26 }
 0x478   : > { %1951 = vrot.lane.b32.xlu1 %v1807_v29, %s3948_s26 }
 0x4ca   : > { %v1849_v60 = vpop.xlane.xlu0 %1848 }
 0x4cb   : > { %3759 = vrcp.f32 %v1849_v60 }
 0x4d1   : > { %v3760_v62 = vpop.eup %3759 }
 0x4d2   : > { %v1852_v61 = vpop.xlane.xlu1 %1851  ;;  %v1855_v0 = vmul.f32 %v3760_v62, %v3756_v52 }
 0x4d3   : > { %3761 = vrcp.f32 %v1852_v61 }
 0x4d9   : > { %v3762_v63 = vpop.eup %3761 }
 0x4da   : > { %v1856_v1 = vmul.f32 %v3762_v63, %v3758_v57 }
 0x4dc   : > { %v1857_v3 = vpack.c.bf16 %v1856_v1, %v1855_v0 }
 0x4dd   : > { %v1950_v7 = vpop.permute.xlu0 %1949 }
 0x4de   : > { %3329 = vmatmul.msk.bf16.vlgmr.msrb.gmra.mxu3 %vm1834_vm9, %v1857_v3 }
 0x4df   : > { %2037 = vmatpush.bf16.xpose.msrb.mxu3 %v2028_v4 }
 0x4ea   : > { %v1952_v5 = vpop.permute.xlu1 %1951 }
 0x4eb   : > { %v1957_v6 = vsel %vm1809_vm8, %v1952_v5, 0 }
 0x4ec   : > { %1966 = vmatpush.bf16.xpose.msrb.mxu2 %v1957_v6 }
 0x4ee   : > { %3330 = vmatmul.msk.bf16.vlgmr.msra.gmra.mxu3 %vm1809_vm8, %v1877_v59 }
 0x4f3   : > { %3332 = vmatmul.msk.bf16.vlgmr.msrb.gmra.mxu2 %vm1809_vm8, %v1950_v7 }
 0x4fe   : > { %3334 = vmatmul.msk.bf16.vlgmr.msrb.gmra.mxu3 %vm1809_vm8, %v2021_v8 }
 0x561   : > { %v4535_v9 = vpop.f32.mrf.mxu3 }
 0x569   : > { %v4537_v10 = vpop.f32.mrf.mxu3 }
 0x571   : > { %v1896_v11 = vpop.f32.mrf.mxu3 }
 0x572   : > { %v1901_v12 = vmul.f32 0.17677669, %v1896_v11 }
 0x574   : > { %v1903_v13 = vadd.f32 %v1901_v12, %v4510_v36 }
 0x576   : > { %v1968_v14 = vpop.f32.mrf.mxu2  ;;  %v1905_v15 = vsel %vm1834_vm9, %v1903_v13, -inf }
 0x577   : > { %v1973_v16 = vmul.f32 0.17677669, %v1968_v14  ;;  %1906 = vmax.xlane.f32.xlu1 %v1905_v15 }
 0x579   : > { %v1898_v17 = vpop.f32.mrf.mxu3  ;;  %v1975_v37 = vadd.f32 %v1973_v16, %v4510_v36 }
 0x57a   : > { %v1902_v18 = vmul.f32 0.17677669, %v1898_v17 }
 0x57b   : > { %v1977_v19 = vsel %vm1834_vm9, %v1975_v37, -inf }
 0x57c   : > { %1978 = vmax.xlane.f32.xlu2 %v1977_v19  ;;  %v1904_v20 = vadd.f32 %v1902_v18, %v4517_v43 }
 0x57e   : > { %v1970_v21 = vpop.f32.mrf.mxu2  ;;  %v1908_v41 = vsel %vm1834_vm9, %v1904_v20, -inf }
 0x57f   : > { %v1974_v22 = vmul.f32 0.17677669, %v1970_v21  ;;  %1909 = vmax.xlane.f32.xlu0 %v1908_v41 }
 0x581   : > { %v2039_v23 = vpop.f32.mrf.mxu3  ;;  %v1976_v24 = vadd.f32 %v1974_v22, %v4517_v43 }
 0x582   : > { %v2044_v25 = vmul.f32 0.17677669, %v2039_v23 }
 0x583   : > { %v1980_v28 = vsel %vm1834_vm9, %v1976_v24, -inf }
 0x584   : > { %1981 = vmax.xlane.f32.xlu1 %v1980_v28  ;;  %v2046_v29 = vadd.f32 %v2044_v25, %v4510_v36 }
 0x586   : > { %v2048_v30 = vsel %vm1834_vm9, %v2046_v29, -inf }
 0x587   : > { %2049 = vmax.xlane.f32.xlu0 %v2048_v30 }
 0x589   : > { %v2041_v31 = vpop.f32.mrf.mxu3 }
 0x58a   : > { %v2045_v32 = vmul.f32 0.17677669, %v2041_v31  ;;  %v3617_v31 = vld [vmem:[%s4218_s5 + $0x38] sm:$0xff] }
 0x58b   : > { %2188 = vmatpush.bf16.msrb.mxu1 %v3617_v31  ;;  %v3412_v31 = vld [vmem:[%s4233_s29 + $0x58] sm:$0xf0] }
 0x58c   : > { %v2047_v35 = vadd.f32 %v2045_v32, %v4517_v43  ;;  %v3616_v32 = vld [vmem:[%s4218_s5 + $0x30] sm:$0xff] }
 0x58e   : > { %v2051_v38 = vsel %vm1834_vm9, %v2047_v35, -inf }
 0x58f   : > { %2052 = vmax.xlane.f32.xlu2 %v2051_v38  ;;  %2189 = vmatpush.bf16.msrb.mxu1 %v3616_v32  ;;  %v3615_v38 = vld [vmem:[%s4218_s5 + $0x28] sm:$0xff] }
 0x593   : > { %2190 = vmatpush.bf16.msrb.mxu1 %v3615_v38  ;;  %v3627_v38 = vld [vmem:[%s4233_s29 + $0x44] sm:$0xf0] }
 0x5a7   : > { %1929 = vrot.lane.b32.xlu2 %v4503_v33, %s3946_s28 }
 0x5ea   : > { %v1907_v39 = vpop.xlane.xlu1 %1906 }
 0x5eb   : > { %v1911_v44 = vsub.f32 %v1903_v13, %v1907_v39 }
 0x5ed   : > { %v1913_v36 = vmul.f32 1.442695, %v1911_v44 }
 0x5ef   : > { %v1979_v40 = vpop.xlane.xlu2 %1978 }
 0x5f0   : > { %v1983_v42 = vsub.f32 %v1975_v37, %v1979_v40 }
 0x5f2   : > { %v1985_v45 = vmul.f32 1.442695, %v1983_v42  ;;  %v1910_v46 = vpop.xlane.xlu0 %1909 }
 0x5f3   : > { %v1912_v49 = vsub.f32 %v1904_v20, %v1910_v46 }
 0x5f4   : > { %3763 = vpow2.f32 %v1985_v45 }
 0x5f5   : > { %3765 = vpow2.f32 %v1913_v36  ;;  %v1915_v54 = vmul.f32 1.442695, %v1912_v49  ;;  %v3612_v49 = vld [vmem:[%s4218_s5 + $0x10] sm:$0xff] }
 0x5f7   : > { %v1982_v47 = vpop.xlane.xlu1 %1981 }
 0x5f8   : > { %v1984_v48 = vsub.f32 %v1976_v24, %v1982_v47  ;;  %v3614_v47 = vld [vmem:[%s4218_s5 + $0x20] sm:$0xff] }
 0x5f9   : > { %2191 = vmatpush.bf16.msrb.mxu1 %v3614_v47 }
 0x5fa   : > { %v3764_v50 = vpop.eup %3763  ;;  %v1987_v43 = vmul.f32 1.442695, %v1984_v48  ;;  %v2050_v51 = vpop.xlane.xlu0 %2049  ;;  %v3613_v48 = vld [vmem:[%s4218_s5 + $0x18] sm:$0xff] }
 0x5fb   : > { %v2054_v52 = vsub.f32 %v2046_v29, %v2050_v51  ;;  %v1989_v53 = vsel %vm1834_vm9, %v3764_v50, 0.0  ;;  %v3766_v56 = vpop.eup %3765 }
 0x5fc   : > { %3767 = vpow2.f32 %v1987_v43  ;;  %1990 = vadd.xlane.f32.xlu1 %v1989_v53  ;;  %v1917_v61 = vsel %vm1834_vm9, %v3766_v56, 0.0  ;;  %v3610_v43 = vld [vmem:[%s4218_s5] sm:$0xff] }
 0x5fd   : > { %v2056_v55 = vmul.f32 1.442695, %v2054_v52  ;;  %3769 = vpow2.f32 %v1915_v54  ;;  %2192 = vmatpush.bf16.msrb.mxu1 %v3613_v48  ;;  %v3396_v48 = vld [vmem:[%s4233_s29 + $0x38] sm:$0xf0] }
 0x5ff   : > { %3771 = vpow2.f32 %v2056_v55 }
 0x601   : > { %2193 = vmatpush.bf16.msrb.mxu1 %v3612_v49 }
 0x602   : > { %v3768_v57 = vpop.eup %3767  ;;  %v2053_v58 = vpop.xlane.xlu2 %2052 }
 0x603   : > { %v2055_v59 = vsub.f32 %v2047_v35, %v2053_v58  ;;  %v1992_v60 = vsel %vm1834_vm9, %v3768_v57, 0.0  ;;  %v3770_v63 = vpop.eup %3769 }
 0x604   : > { %1993 = vadd.xlane.f32.xlu0 %v1992_v60  ;;  %1918 = vadd.xlane.f32.xlu1 %v1917_v61  ;;  %v1920_v2 = vsel %vm1834_vm9, %v3770_v63, 0.0 }
 0x605   : > { %v2058_v62 = vmul.f32 1.442695, %v2055_v59  ;;  %v3772_v0 = vpop.eup %3771 }
 0x606   : > { %v2060_v3 = vsel %vm1834_vm9, %v3772_v0, 0.0 }
 0x607   : > { %3773 = vpow2.f32 %v2058_v62 }
 0x60a   : > { %v1930_v1 = vpop.permute.xlu2 %1929 }
 0x60b   : > { %1942 = vmatpush.bf16.msrb.mxu0 %v1930_v1 }
 0x60c   : > { %1921 = vadd.xlane.f32.xlu0 %v1920_v2  ;;  %2061 = vadd.xlane.f32.xlu1 %v2060_v3 }
 0x60d   : > { %v3774_v4 = vpop.eup %3773 }
 0x60e   : > { %v2063_v5 = vsel %vm1834_vm9, %v3774_v4, 0.0 }
 0x614   : > { %2064 = vadd.xlane.f32.xlu0 %v2063_v5 }
 0x625   : > { %2000 = vrot.lane.b32.xlu1 %v4503_v33, %s3948_s26 }
 0x628   : > { %2071 = vrot.lane.b32.xlu0 %v4503_v33, %s3947_s4 }
 0x66f   : > { %v1991_v6 = vpop.xlane.xlu1 %1990 }
 0x677   : > { %v1994_v7 = vpop.xlane.xlu0 %1993  ;;  %v1919_v8 = vpop.xlane.xlu1 %1918 }
 0x678   : > { %3775 = vrcp.f32 %v1919_v8 }
 0x67e   : > { %v3776_v12 = vpop.eup %3775 }
 0x67f   : > { %v1922_v11 = vpop.xlane.xlu0 %1921  ;;  %v1925_v14 = vmul.f32 %v3776_v12, %v3766_v56  ;;  %v2062_v37 = vpop.xlane.xlu1 %2061 }
 0x680   : > { %3777 = vrcp.f32 %v1922_v11 }
 0x681   : > { %3779 = vrcp.f32 %v1994_v7 }
 0x682   : > { %3781 = vrcp.f32 %v1991_v6 }
 0x686   : > { %v3778_v13 = vpop.eup %3777 }
 0x687   : > { %v1926_v15 = vmul.f32 %v3778_v13, %v3770_v63  ;;  %v2065_v17 = vpop.xlane.xlu0 %2064  ;;  %v3780_v33 = vpop.eup %3779 }
 0x688   : > { %3783 = vrcp.f32 %v2065_v17  ;;  %v3782_v18 = vpop.eup %3781  ;;  %v1998_v20 = vmul.f32 %v3780_v33, %v3768_v57  ;;  %v3633_v17 = vld [vmem:[%s4233_s29 + $0x74] sm:$0xf0] }
 0x689   : > { %v1927_v16 = vpack.c.bf16 %v1926_v15, %v1925_v14  ;;  %3785 = vrcp.f32 %v2062_v37  ;;  %v1997_v41 = vmul.f32 %v3782_v18, %v3764_v50  ;;  %v3611_v50 = vld [vmem:[%s4218_s5 + $0x8] sm:$0xff]  ;;  %v3632_v37 = vld [vmem:[%s4233_s29 + $0x74] sm:$0xf]  ;;  %v3428_v18 = vld [vmem:[%s4233_s29 + $0x78] sm:$0xf0] }
 0x68a   : > { %2194 = vmatpush.bf16.msrb.mxu1 %v3611_v50  ;;  %v3386_v50 = vld [vmem:[%s4233_s29 + $0x20] sm:$0xf] }
 0x68b   : > { %3331 = vmatmul.msk.bf16.vlgmr.msrb.gmra.mxu0 %vm1834_vm9, %v1927_v16  ;;  %v1999_v24 = vpack.c.bf16 %v1998_v20, %v1997_v41  ;;  %v3426_v16 = vld [vmem:[%s4233_s29 + $0x70] sm:$0xf]  ;;  %v3418_v20 = vld [vmem:[%s4233_s29 + $0x60] sm:$0xf]  ;;  %v3630_v41 = vld [vmem:[%s4233_s29 + $0x64] sm:$0xf] }
 0x68c   : > { %v3427_v33 = vor.u32 %v3633_v17, %v3426_v16 }
 0x68e   : > { %v3784_v19 = vpop.eup %3783  ;;  %2195 = vmatpush.bf16.msrb.mxu1 %v3610_v43  ;;  %v3623_v43 = vld [vmem:[%s4233_s29 + $0x24] sm:$0xf0] }
 0x68f   : > { %v3786_v21 = vpop.eup %3785  ;;  %v2069_v23 = vmul.f32 %v3784_v19, %v3774_v4  ;;  %v3431_v19 = vor.u32 %v3632_v37, %v3428_v18 }
 0x690   : > { %v2068_v25 = vmul.f32 %v3786_v21, %v3772_v0  ;;  %v3631_v21 = vld [vmem:[%s4233_s29 + $0x64] sm:$0xf0] }
 0x691   : > { %2379 = vmatpush.bf16.msra.mxu3 %v3431_v19 }
 0x692   : > { %v2070_v29 = vpack.c.bf16 %v2069_v23, %v2068_v25  ;;  %v3420_v23 = vld [vmem:[%s4233_s29 + $0x68] sm:$0xf0]  ;;  %v3410_v25 = vld [vmem:[%s4233_s29 + $0x50] sm:$0xf] }
 0x697   : > { %v2001_v22 = vpop.permute.xlu1 %2000 }
 0x698   : > { %2013 = vmatpush.bf16.msra.mxu2 %v2001_v22  ;;  %v3419_v22 = vor.u32 %v3631_v21, %v3418_v20 }
 0x69a   : > { %v2072_v28 = vpop.permute.xlu0 %2071 }
 0x69b   : > { %3333 = vmatmul.msk.bf16.vlgmr.msra.gmra.mxu2 %vm1834_vm9, %v1999_v24  ;;  %2084 = vmatpush.bf16.msra.mxu0 %v2072_v28  ;;  %v3423_v24 = vor.u32 %v3630_v41, %v3420_v23  ;;  %v3629_v28 = vld [vmem:[%s4233_s29 + $0x54] sm:$0xf0]  ;;  %v3746_v41 = vld [vmem:[%s987_s6] ss:$0 sm:$0xff] }
 0x69c   : > { %2365 = vmatpush.bf16.msrb.mxu2 %v3427_v33 }
 0x69d   : > { %2380 = vmatpush.bf16.msra.mxu3 %v3423_v24 }
 0x69e   : > { %3335 = vmatmul.msk.bf16.vlgmr.msra.gmra.mxu0 %vm1834_vm9, %v2070_v29  ;;  %v3628_v29 = vld [vmem:[%s4233_s29 + $0x54] sm:$0xf] }
 0x69f   : > { %v3415_v32 = vor.u32 %v3628_v29, %v3412_v31 }
 0x6a0   : > { %2366 = vmatpush.bf16.msrb.mxu2 %v3419_v22 }
 0x6a1   : > { %2381 = vmatpush.bf16.msra.mxu3 %v3415_v32  ;;  %v3641_v32 = vld [vmem:[%s4178_s30 + $0x38] sm:$0xff] }
 0x6a2   : > { %2563 = vmatpush.bf16.msrb.mxu0 %v3641_v32 }
 0x708   : > { %v1944_v30 = vpop.f32.mrf.mxu0 }
 0x710   : > { %v1946_v39 = vpop.f32.mrf.mxu0 }
 0x711   : > { %v3732_v45 = vpack.i.bf16 %v1946_v39, %v1944_v30  ;;  %v3411_v30 = vor.u32 %v3629_v28, %v3410_v25  ;;  %v3626_v39 = vld [vmem:[%s4233_s29 + $0x44] sm:$0xf] }
 0x713   : > { %2367 = vmatpush.bf16.msrb.mxu2 %v3411_v30 }
 0x71b   : > { %v2086_v44 = vpop.f32.mrf.mxu0 }
 0x71e   : > { %v2015_v35 = vpop.f32.mrf.mxu2 }
 0x723   : > { %v2088_v46 = vpop.f32.mrf.mxu0 }
 0x724   : > { %v3737_v36 = vpack.i.bf16 %v2088_v46, %v2086_v44  ;;  %v3625_v46 = vld [vmem:[%s4233_s29 + $0x34] sm:$0xf0] }
 0x726   : > { %v2017_v40 = vpop.f32.mrf.mxu2 }
 0x727   : > { %v3727_v42 = vpack.i.bf16 %v2017_v40, %v2015_v35  ;;  %v3402_v35 = vld [vmem:[%s4233_s29 + $0x40] sm:$0xf] }
 0x728   : > { %v3403_v40 = vor.u32 %v3627_v38, %v3402_v35  ;;  %v3649_v35 = vld [vmem:[%s4178_s30 + $0x78] sm:$0xff]  ;;  %v3648_v38 = vld [vmem:[%s4178_s30 + $0x70] sm:$0xff] }
 0x729   : > { %3728 = vrot.lane.b32.xlu2 %v3727_v42, %s3948_s26  ;;  %v3404_v42 = vld [vmem:[%s4233_s29 + $0x48] sm:$0xf0]  ;;  %2577 = vmatpush.bf16.msra.mxu1 %v3649_v35  ;;  %s4823_s26 = sld [smem:[#allocation26_spill]] (!%p3496_p5) }
 0x72a   : > { %v3407_v44 = vor.u32 %v3626_v39, %v3404_v42  ;;  %2368 = vmatpush.bf16.msrb.mxu2 %v3403_v40  ;;  %v3639_v39 = vld [vmem:[%s4178_s30 + $0x28] sm:$0xff]  ;;  %v3638_v42 = vld [vmem:[%s4178_s30 + $0x20] sm:$0xff] }
 0x72b   : > { %v3647_v40 = vld [vmem:[%s4178_s30 + $0x68] sm:$0xff] }
 0x72c   : > { %2382 = vmatpush.bf16.msra.mxu3 %v3407_v44  ;;  %v3646_v44 = vld [vmem:[%s4178_s30 + $0x60] sm:$0xff] }
 0x72d   : > { %2578 = vmatpush.bf16.msra.mxu1 %v3648_v38 }
 0x731   : > { %3733 = vrot.lane.b32.xlu2 %v3732_v45, %s3947_s4  ;;  %v3394_v45 = vld [vmem:[%s4233_s29 + $0x30] sm:$0xf]  ;;  %2579 = vmatpush.bf16.msra.mxu1 %v3647_v40 }
 0x732   : > { %v3395_v47 = vor.u32 %v3625_v46, %v3394_v45  ;;  %v3637_v45 = vld [vmem:[%s4178_s30 + $0x18] sm:$0xff] }
 0x733   : > { %v3645_v46 = vld [vmem:[%s4178_s30 + $0x58] sm:$0xff] }
 0x734   : > { %2369 = vmatpush.bf16.msrb.mxu2 %v3395_v47  ;;  %v3644_v47 = vld [vmem:[%s4178_s30 + $0x50] sm:$0xff] }
 0x735   : > { %2580 = vmatpush.bf16.msra.mxu1 %v3646_v44 }
 0x739   : > { %3738 = vrot.lane.b32.xlu2 %v3737_v36, %s3946_s28  ;;  %v3624_v36 = vld [vmem:[%s4233_s29 + $0x34] sm:$0xf]  ;;  %2581 = vmatpush.bf16.msra.mxu1 %v3645_v46 }
 0x73a   : > { %v3399_v49 = vor.u32 %v3624_v36, %v3396_v48  ;;  %v3636_v36 = vld [vmem:[%s4178_s30 + $0x10] sm:$0xff] }
 0x73b   : > { %v2279_v48 = vld [vmem:[%s4238_s2] sm:$0x3]  ;;  %s4826_s2 = sld [smem:[#allocation27_spill]] (!%p3496_p5) }
 0x73c   : > { %2383 = vmatpush.bf16.msra.mxu3 %v3399_v49  ;;  %v3635_v49 = vld [vmem:[%s4178_s30 + $0x8] sm:$0xff] }
 0x73d   : > { %2582 = vmatpush.bf16.msra.mxu1 %v3644_v47 }
 0x783   : > { %v3729_v51 = vpop.permute.xlu2 %3728 }
 0x784   : > { %v3731_v57 = vunpack.i.h.bf16 %v3729_v51  ;;  %v3730_v58 = vunpack.i.l.bf16 %v3729_v51  ;;  %v3622_v51 = vld [vmem:[%s4233_s29 + $0x24] sm:$0xf] }
 0x78b   : > { %v3734_v52 = vpop.permute.xlu2 %3733 }
 0x78c   : > { %v3736_v53 = vunpack.i.h.bf16 %v3734_v52  ;;  %v3735_v54 = vunpack.i.l.bf16 %v3734_v52  ;;  %v3387_v52 = vor.u32 %v3623_v43, %v3386_v50  ;;  %v3643_v50 = vld [vmem:[%s4178_s30 + $0x48] sm:$0xff]  ;;  %v2281_v43 = vperm.slane %v2279_v48, 0 }
 0x78d   : > { %2583 = vmatpush.bf16.msra.mxu1 %v3643_v50 }
 0x78e   : > { %v2116_v55 = vsel %vm1809_vm8, %v4537_v10, %v3736_v53  ;;  %v2115_v56 = vsel %vm1809_vm8, %v4535_v9, %v3735_v54  ;;  %v3745_v10 = vld [vmem:[%s4819_s21] ss:$0 sm:$0xff]  ;;  %v3388_v53 = vld [vmem:[%s4233_s29 + $0x28] sm:$0xf0]  ;;  %2370 = vmatpush.bf16.msrb.mxu2 %v3387_v52  ;;  %s4824_s21 = sld [smem:[#allocation30_spill]] (!%p3496_p5) }
 0x78f   : > { %v2118_v62 = vsel %vm2117_vm10, %v2115_v56, %v3730_v58  ;;  %v2119_v63 = vsel %vm2117_vm10, %v2116_v55, %v3731_v57  ;;  %v3391_v54 = vor.u32 %v3622_v51, %v3388_v53  ;;  %v3378_v55 = vld [vmem:[%s4233_s29 + $0x10] sm:$0xf]  ;;  %v3621_v56 = vld [vmem:[%s4233_s29 + $0x14] sm:$0xf0]  ;;  %v3620_v57 = vld [vmem:[%s4233_s29 + $0x14] sm:$0xf] }
 0x790   : > { %v3379_v58 = vor.u32 %v3621_v56, %v3378_v55  ;;  %v2282_v51 = vperm.slane %v2279_v48, 1  ;;  %v3642_v55 = vld [vmem:[%s4178_s30 + $0x40] sm:$0xff] }
 0x791   : > { %2384 = vmatpush.bf16.msra.mxu3 %v3391_v54  ;;  %v3634_v54 = vld [vmem:[%s4178_s30] sm:$0xff]  ;;  %2584 = vmatpush.bf16.msra.mxu1 %v3642_v55 }
 0x792   : > { %2371 = vmatpush.bf16.msrb.mxu2 %v3379_v58 }
 0x793   : > { %v3739_v59 = vpop.permute.xlu2 %3738 }
 0x794   : > { %v3741_v60 = vunpack.i.h.bf16 %v3739_v59  ;;  %v3740_v61 = vunpack.i.l.bf16 %v3739_v59  ;;  %v3380_v59 = vld [vmem:[%s4233_s29 + $0x18] sm:$0xf0] }
 0x796   : > { %v2121_v0 = vsel %vm2120_vm11, %v2118_v62, %v3740_v61  ;;  %v2122_v1 = vsel %vm2120_vm11, %v2119_v63, %v3741_v60  ;;  %v3370_v60 = vld [vmem:[%s4233_s29] sm:$0xf]  ;;  %v3619_v61 = vld [vmem:[%s4233_s29 + $0x4] sm:$0xf0]  ;;  %v3383_v63 = vor.u32 %v3620_v57, %v3380_v59 }
 0x797   : > { %v2123_v2 = vpack.c.bf16 %v2122_v1, %v2121_v0  ;;  %v3618_v0 = vld [vmem:[%s4233_s29 + $0x4] sm:$0xf]  ;;  %v3372_v1 = vld [vmem:[%s4233_s29 + $0x8] sm:$0xf0] }
 0x798   : > { %2385 = vmatpush.bf16.msra.mxu3 %v3383_v63 }
 0x799   : > { %2196 = vmatmul.bf16.vlgmr.msrb.gmra.mxu1 %v2123_v2 }
 0x816   : > { %v2197_v3 = vpop.f32.mrf.mxu1 }
 0x817   : > { %v2202_v9 = vadd.f32 %v2197_v3, %v4414_v26  ;;  %v3375_v3 = vor.u32 %v3618_v0, %v3372_v1 }
 0x819   : > { %v4587_v4 = vadd.f32 %v3745_v10, %v2202_v9  ;;  %2386 = vmatpush.bf16.msra.mxu3 %v3375_v3 }
 0x81b   : > { %2212 = vadd.xlane.f32.xlu0 %v4587_v4 }
 0x81e   : > { %v2199_v5 = vpop.f32.mrf.mxu1 }
 0x81f   : > { %v2203_v6 = vadd.f32 %v2199_v5, %v4417_v27 }
 0x821   : > { %v4591_v7 = vadd.f32 %v3745_v10, %v2203_v6  ;;  %v3371_v10 = vor.u32 %v3619_v61, %v3370_v60 }
 0x823   : > { %2214 = vadd.xlane.f32.xlu1 %v4591_v7  ;;  %2372 = vmatpush.bf16.msrb.mxu2 %v3371_v10 }
 0x88e   : > { %v2213_v8 = vpop.xlane.xlu0 %2212 }
 0x88f   : > { %v2216_v11 = vmul.f32 %v2213_v8, %v4420_v34 }
 0x891   : > { %v4596_v26 = vsub.f32 %v4587_v4, %v2216_v11 }
 0x893   : > { %v2220_v12 = vmul.f32 %v4596_v26, %v4596_v26 }
 0x895   : > { %2222 = vadd.xlane.f32.xlu2 %v2220_v12 }
 0x896   : > { %v2215_v13 = vpop.xlane.xlu1 %2214 }
 0x897   : > { %v2217_v27 = vmul.f32 %v2215_v13, %v4420_v34 }
 0x899   : > { %v4602_v14 = vsub.f32 %v4591_v7, %v2217_v27 }
 0x89b   : > { %v2221_v15 = vmul.f32 %v4602_v14, %v4602_v14 }
 0x89d   : > { %2224 = vadd.xlane.f32.xlu0 %v2221_v15 }
 0x908   : > { %v2223_v62 = vpop.xlane.xlu2 %2222 }
 0x909   : > { %v2226_v2 = vmul.f32 %v2223_v62, %v4420_v34 }
 0x90b   : > { %v2228_v9 = vadd.f32 1e-06, %v2226_v2 }
 0x90d   : > { %3787 = vrsqrt.f32 %v2228_v9  ;;  %vm2236_vm13 = vweird.f32 %v2228_v9 }
 0x910   : > { %v2225_v5 = vpop.xlane.xlu0 %2224 }
 0x911   : > { %v2227_v6 = vmul.f32 %v2225_v5, %v4420_v34 }
 0x913   : > { %v3788_v8 = vpop.eup %3787  ;;  %v2229_v11 = vadd.f32 1e-06, %v2227_v6 }
 0x914   : > { %v2231_v12 = vmul.f32 %v3788_v8, %v2228_v9  ;;  %vm2237_vm12 = vweird.f32 %v3788_v8 }
 0x915   : > { %3789 = vrsqrt.f32 %v2229_v11  ;;  %vm2238_vm14 = vmor %vm2236_vm13, %vm2237_vm12  ;;  %vm2246_vm0 = vweird.f32 %v2229_v11 }
 0x916   : > { %v2232_v13 = vmul.f32 %v3788_v8, %v2231_v12 }
 0x918   : > { %v2233_v27 = vmul.f32 0.5, %v2232_v13 }
 0x91a   : > { %v2234_v15 = vsub.f32 1.5, %v2233_v27 }
 0x91b   : > { %v3790_v16 = vpop.eup %3789 }
 0x91c   : > { %v2235_v17 = vmul.f32 %v3788_v8, %v2234_v15  ;;  %v2241_v37 = vmul.f32 %v3790_v16, %v2229_v11  ;;  %vm2247_vm15 = vweird.f32 %v3790_v16 }
 0x91d   : > { %vm2248_vm1 = vmor %vm2246_vm0, %vm2247_vm15 }
 0x91e   : > { %v2242_v33 = vmul.f32 %v3790_v16, %v2241_v37  ;;  %v2239_v18 = vsel %vm2238_vm14, %v3788_v8, %v2235_v17 }
 0x91f   : > { %v2250_v21 = vmul.f32 %v2239_v18, %v4596_v26  ;;  %v3747_v26 = vld [vmem:[%s4820_s25] ss:$0 sm:$0xff] }
 0x920   : > { %v2243_v19 = vmul.f32 0.5, %v2242_v33 }
 0x921   : > { %v2255_v25 = vmul.f32 %v3746_v41, %v2250_v21 }
 0x922   : > { %v2244_v20 = vsub.f32 1.5, %v2243_v19 }
 0x923   : > { %v2260_v29 = vadd.f32 %v3747_v26, %v2255_v25 }
 0x924   : > { %v2245_v22 = vmul.f32 %v3790_v16, %v2244_v20 }
 0x926   : > { %v2249_v23 = vsel %vm2248_vm1, %v3790_v16, %v2245_v22 }
 0x927   : > { %v2251_v24 = vmul.f32 %v2249_v23, %v4602_v14  ;;  %v3640_v14 = vld [vmem:[%s4178_s30 + $0x30] sm:$0xff] }
 0x928   : > { %2564 = vmatpush.bf16.msrb.mxu0 %v3640_v14 }
 0x929   : > { %v2256_v28 = vmul.f32 %v3746_v41, %v2251_v24 }
 0x92b   : > { %v2261_v30 = vadd.f32 %v3747_v26, %v2256_v28 }
 0x92c   : > { %2565 = vmatpush.bf16.msrb.mxu0 %v3639_v39  ;;  %v3748_v39 = vld [vmem:[%s1002_s10] ss:$0 sm:$0xff]  ;;  %s4822_s10 = sld [smem:[#allocation25_spill]] (!%p3496_p5) }
 0x92d   : > { %v2262_v31 = vpack.c.bf16 %v2261_v30, %v2260_v29 }
 0x92f   : > { %2373 = vmatmul.bf16.vlgmr.msrb.gmra.mxu2 %v2262_v31  ;;  %2387 = vmatmul.bf16.vlgmr.msra.gmra.mxu3 %v2262_v31 }
 0x930   : > { %2566 = vmatpush.bf16.msrb.mxu0 %v3638_v42 }
 0x934   : > { %2567 = vmatpush.bf16.msrb.mxu0 %v3637_v45 }
 0x938   : > { %2568 = vmatpush.bf16.msrb.mxu0 %v3636_v36 }
 0x93c   : > { %2569 = vmatpush.bf16.msrb.mxu0 %v3635_v49 }
 0x940   : > { %2570 = vmatpush.bf16.msrb.mxu0 %v3634_v54 }
 0x9b2   : > { %v2374_v52 = vpop.f32.mrf.mxu2  ;;  %v2388_v53 = vpop.f32.mrf.mxu3 }
 0x9b3   : > { %v2375_v56 = vadd.f32 %v2374_v52, %v2281_v43  ;;  %v2389_v57 = vadd.f32 %v2388_v53, %v2282_v51 }
 0x9b5   : > { %v2393_v58 = vmul.f32 %v2375_v56, %v2375_v56  ;;  %v2394_v59 = vmul.f32 %v2389_v57, %v2389_v57 }
 0x9b7   : > { %v2397_v60 = vmul.f32 %v2393_v58, %v2375_v56  ;;  %v2398_v61 = vmul.f32 %v2394_v59, %v2389_v57 }
 0x9b9   : > { %v2401_v62 = vmul.f32 0.044715, %v2397_v60  ;;  %v2402_v63 = vmul.f32 0.044715, %v2398_v61 }
 0x9ba   : > { %v2376_v0 = vpop.f32.mrf.mxu2  ;;  %v2390_v1 = vpop.f32.mrf.mxu3 }
 0x9bb   : > { %v2405_v2 = vadd.f32 %v2401_v62, %v2375_v56  ;;  %v2406_v10 = vadd.f32 %v2402_v63, %v2389_v57  ;;  %v2377_v3 = vadd.f32 %v2376_v0, %v2281_v43  ;;  %v2391_v9 = vadd.f32 %v2390_v1, %v2282_v51 }
 0x9bd   : > { %v2409_v5 = vmul.f32 0.7978846, %v2405_v2  ;;  %v2395_v6 = vmul.f32 %v2377_v3, %v2377_v3  ;;  %v2396_v8 = vmul.f32 %v2391_v9, %v2391_v9  ;;  %v2410_v11 = vmul.f32 0.7978846, %v2406_v10 }
 0x9bf   : > { %v2399_v12 = vmul.f32 %v2395_v6, %v2377_v3  ;;  %v2400_v13 = vmul.f32 %v2396_v8, %v2391_v9  ;;  %3791 = vtanh.f32 %v2409_v5 }
 0x9c0   : > { %3793 = vtanh.f32 %v2410_v11 }
 0x9c1   : > { %v2403_v27 = vmul.f32 0.044715, %v2399_v12  ;;  %v2404_v15 = vmul.f32 0.044715, %v2400_v13 }
 0x9c3   : > { %v2407_v16 = vadd.f32 %v2403_v27, %v2377_v3  ;;  %v2408_v17 = vadd.f32 %v2404_v15, %v2391_v9 }
 0x9c5   : > { %v2411_v37 = vmul.f32 0.7978846, %v2407_v16  ;;  %v2412_v33 = vmul.f32 0.7978846, %v2408_v17  ;;  %v3792_v18 = vpop.eup %3791 }
 0x9c6   : > { %v3794_v19 = vpop.eup %3793  ;;  %v2417_v20 = vadd.f32 1.0, %v3792_v18 }
 0x9c7   : > { %3795 = vtanh.f32 %v2411_v37  ;;  %v2418_v21 = vadd.f32 1.0, %v3794_v19 }
 0x9c8   : > { %3797 = vtanh.f32 %v2412_v33  ;;  %v2421_v23 = vmul.f32 0.5, %v2417_v20 }
 0x9c9   : > { %v2422_v25 = vmul.f32 0.5, %v2418_v21 }
 0x9ca   : > { %v2425_v30 = vmul.f32 %v2421_v23, %v2375_v56 }
 0x9cb   : > { %v2426_v32 = vmul.f32 %v2422_v25, %v2389_v57 }
 0x9cd   : > { %v3796_v41 = vpop.eup %3795 }
 0x9ce   : > { %v3798_v22 = vpop.eup %3797  ;;  %v2419_v24 = vadd.f32 1.0, %v3796_v41 }
 0x9cf   : > { %v2420_v26 = vadd.f32 1.0, %v3798_v22 }
 0x9d0   : > { %v2423_v28 = vmul.f32 0.5, %v2419_v24 }
 0x9d1   : > { %v2424_v29 = vmul.f32 0.5, %v2420_v26 }
 0x9d2   : > { %v2427_v31 = vmul.f32 %v2423_v28, %v2377_v3 }
 0x9d3   : > { %v2428_v35 = vmul.f32 %v2424_v29, %v2391_v9 }
 0x9d4   : > { %v2429_v14 = vpack.c.bf16 %v2427_v31, %v2425_v30 }
 0x9d5   : > { %v2430_v38 = vpack.c.bf16 %v2428_v35, %v2426_v32 }
 0x9d6   : > { %2571 = vmatmul.bf16.vlgmr.msrb.gmra.mxu0 %v2429_v14 }
 0x9d7   : > { %2585 = vmatmul.bf16.vlgmr.msra.gmra.mxu1 %v2430_v38 }
 0xa53   : > { %v2572_v40 = vpop.f32.mrf.mxu0 }
 0xa54   : > { %v2573_v42 = vadd.f32 %v3748_v39, %v2572_v40  ;;  %v2586_v44 = vpop.f32.mrf.mxu1 }
 0xa56   : > { %v2587_v45 = vadd.f32 %v2586_v44, %v2573_v42 }
 0xa58   : > { %v2591_v46 = vadd.f32 %v2587_v45, %v4587_v4 }
 0xa5a   : > { %2593 = vst [vmem:[#allocation2] sm:$0xff] %v2591_v46 }
 0xa5b   : > { %v2574_v36 = vpop.f32.mrf.mxu0 }
 0xa5c   : > { %v2575_v47 = vadd.f32 %v3748_v39, %v2574_v36  ;;  %v2588_v48 = vpop.f32.mrf.mxu1 }
 0xa5e   : > { %v2589_v49 = vadd.f32 %v2588_v48, %v2575_v47  ;;  %2598 = sbr.rel (%p3496_p5) target bundleno = 3402 (0xd4a), region = 140 }
 0xa60   : > { %v2592_v50 = vadd.f32 %v2589_v49, %v4591_v7 }
 0xa62   : > { %2594 = vst [vmem:[#allocation2 + $0x8] sm:$0xff] %v2592_v50 }
 0xa63   : > { %2603 = vadd.xlane.f32.xlu0 %v2592_v50  ;;  %v3799_v5 = vld [vmem:[%s4822_s10] ss:$0 sm:$0xff]  ;;  %v3949_v20 = vmov 2.0   ;;  %vm2679_vm8 = vcmask 1041408   ;;  %s4827_s10 = sld [smem:[#allocation18_spill]]  ;;  %vm2728_vm13 = vcmask 15360  }
 0xa64   : > { %v3800_v11 = vld [vmem:[%s4823_s26] ss:$0 sm:$0xff] }
 0xa65   : > { %v2653_v19 = vld [vmem:[%s4825_s27] sm:$0x3] }
 0xa6b   : > { %2601 = vadd.xlane.f32.xlu0 %v2591_v46 }
 0xad6   : > { %v2604_v43 = vpop.xlane.xlu0 %2603 }
 0xad7   : > { %v2606_v51 = vmul.f32 %v2604_v43, %v4420_v34  ;;  %v3657_v43 = vld [vmem:[#allocation7 + $0x38] sm:$0xff] }
 0xad8   : > { %2828 = vmatpush.bf16.msra.mxu2 %v3657_v43 }
 0xad9   : > { %v2608_v52 = vsub.f32 %v2592_v50, %v2606_v51  ;;  %v3656_v51 = vld [vmem:[#allocation7 + $0x30] sm:$0xff] }
 0xadb   : > { %v2610_v53 = vmul.f32 %v2608_v52, %v2608_v52 }
 0xadc   : > { %2829 = vmatpush.bf16.msra.mxu2 %v3656_v51 }
 0xadd   : > { %2613 = vadd.xlane.f32.xlu1 %v2610_v53 }
 0xade   : > { %v2602_v4 = vpop.xlane.xlu0 %2601 }
 0xadf   : > { %v2605_v54 = vmul.f32 %v2602_v4, %v4420_v34 }
 0xae1   : > { %v2607_v55 = vsub.f32 %v2591_v46, %v2605_v54  ;;  %v3655_v54 = vld [vmem:[#allocation7 + $0x28] sm:$0xff] }
 0xae2   : > { %2830 = vmatpush.bf16.msra.mxu2 %v3655_v54 }
 0xae3   : > { %v2609_v56 = vmul.f32 %v2607_v55, %v2607_v55 }
 0xae5   : > { %2611 = vadd.xlane.f32.xlu1 %v2609_v56 }
 0xb50   : > { %v2614_v57 = vpop.xlane.xlu1 %2613 }
 0xb51   : > { %v2616_v7 = vmul.f32 %v2614_v57, %v4420_v34  ;;  %v3654_v57 = vld [vmem:[#allocation7 + $0x20] sm:$0xff] }
 0xb52   : > { %2831 = vmatpush.bf16.msra.mxu2 %v3654_v57 }
 0xb53   : > { %v2618_v58 = vadd.f32 1e-06, %v2616_v7 }
 0xb55   : > { %3803 = vrsqrt.f32 %v2618_v58  ;;  %vm2635_vm3 = vweird.f32 %v2618_v58 }
 0xb58   : > { %v2612_v59 = vpop.xlane.xlu1 %2611 }
 0xb59   : > { %v2615_v60 = vmul.f32 %v2612_v59, %v4420_v34 }
 0xb5b   : > { %v3804_v61 = vpop.eup %3803  ;;  %v2617_v62 = vadd.f32 1e-06, %v2615_v60  ;;  %v3653_v60 = vld [vmem:[#allocation7 + $0x18] sm:$0xff] }
 0xb5c   : > { %v2630_v63 = vmul.f32 %v3804_v61, %v2618_v58  ;;  %vm2636_vm2 = vweird.f32 %v3804_v61  ;;  %v3801_v58 = vld [vmem:[%s4826_s2] ss:$0 sm:$0xff]  ;;  %2832 = vmatpush.bf16.msra.mxu2 %v3653_v60 }
 0xb5d   : > { %3805 = vrsqrt.f32 %v2617_v62  ;;  %vm2637_vm4 = vmor %vm2635_vm3, %vm2636_vm2  ;;  %vm2625_vm6 = vweird.f32 %v2617_v62 }
 0xb5e   : > { %v2631_v0 = vmul.f32 %v3804_v61, %v2630_v63  ;;  %3807 = vrcp.f32 %v3949_v20 }
 0xb60   : > { %v2632_v1 = vmul.f32 0.5, %v2631_v0 }
 0xb62   : > { %v2633_v2 = vsub.f32 1.5, %v2632_v1 }
 0xb63   : > { %v3806_v10 = vpop.eup %3805 }
 0xb64   : > { %v2634_v3 = vmul.f32 %v3804_v61, %v2633_v2  ;;  %v2620_v9 = vmul.f32 %v3806_v10, %v2617_v62  ;;  %vm2626_vm5 = vweird.f32 %v3806_v10  ;;  %v3808_v21 = vpop.eup %3807  ;;  %v3802_v62 = vld [vmem:[#allocation5] ss:$0 sm:$0xff]  ;;  %v2725_v2 = vld [vmem:[%s4827_s10] sm:$0xff] }
 0xb65   : > { %vm2627_vm7 = vmor %vm2625_vm6, %vm2626_vm5  ;;  %v2688_v41 = vmul.f32 2.0, %v3808_v21  ;;  %vm2692_vm10 = vweird.f32 %v3808_v21 }
 0xb66   : > { %v2638_v6 = vsel %vm2637_vm4, %v3804_v61, %v2634_v3  ;;  %v2621_v8 = vmul.f32 %v3806_v10, %v2620_v9  ;;  %v3652_v3 = vld [vmem:[#allocation7 + $0x10] sm:$0xff]  ;;  %v3651_v9 = vld [vmem:[#allocation7 + $0x8] sm:$0xff] }
 0xb67   : > { %v2640_v34 = vmul.f32 %v2638_v6, %v2608_v52  ;;  %v2689_v22 = vsub.f32 1.0, %v2688_v41  ;;  %2833 = vmatpush.bf16.msra.mxu2 %v3652_v3 }
 0xb68   : > { %v2622_v12 = vmul.f32 0.5, %v2621_v8 }
 0xb69   : > { %v2645_v13 = vmul.f32 %v3799_v5, %v2640_v34  ;;  %v2690_v26 = vmul.f32 %v3808_v21, %v2689_v22 }
 0xb6a   : > { %v2623_v27 = vsub.f32 1.5, %v2622_v12 }
 0xb6b   : > { %v4687_v15 = vadd.f32 %v3800_v11, %v2645_v13  ;;  %v2691_v30 = vadd.f32 %v3808_v21, %v2690_v26  ;;  %2834 = vmatpush.bf16.msra.mxu2 %v3651_v9 }
 0xb6c   : > { %v2624_v16 = vmul.f32 %v3806_v10, %v2623_v27 }
 0xb6d   : > { %2652 = vst [vmem:[%s4824_s21 + $0x8] sm:$0xff] %v4687_v15  ;;  %2671 = vmatpush.msra.mxu0 %v4687_v15  ;;  %v2693_v35 = vsel %vm2692_vm10, %v3808_v21, %v2691_v30 }
 0xb6e   : > { %v2628_v17 = vsel %vm2627_vm7, %v3806_v10, %v2624_v16  ;;  %v2726_v10 = vld [vmem:[%s4827_s10 + $0x8] sm:$0xff] }
 0xb6f   : > { %v2639_v37 = vmul.f32 %v2628_v17, %v2607_v55 }
 0xb71   : > { %v2644_v33 = vmul.f32 %v3799_v5, %v2639_v37  ;;  %v3650_v5 = vld [vmem:[#allocation7] sm:$0xff] }
 0xb72   : > { %2835 = vmatpush.bf16.msra.mxu2 %v3650_v5 }
 0xb73   : > { %v4694_v18 = vadd.f32 %v3800_v11, %v2644_v33 }
 0xb75   : > { %2651 = vst [vmem:[%s4824_s21] sm:$0xff] %v4694_v18  ;;  %2672 = vmatpush.msra.mxu0 %v4694_v18 }
 0xb76   : > { %3497 = vmatmul.msk.f32.vlgmr.msra.gmra.mxu0 %vm1834_vm9, %v2653_v19 }
 0xbf3   : > { %v2674_v23 = vpop.f32.mrf.mxu0 }
 0xbf4   : > { %v2680_v24 = vsel %vm2679_vm8, %v2674_v23, 0.0 }
 0xbf5   : > { %v2681_v25 = vrot.slane %v2680_v24, 4 }
 0xbf7   : > { %v2682_v28 = vadd.f32 %v2681_v25, %v2680_v24 }
 0xbf9   : > { %v2683_v29 = vrot.slane %v2682_v28, 2 }
 0xbfb   : > { %v2684_v31 = vadd.f32 %v2683_v29, %v2682_v28 }
 0xbfd   : > { %v2685_v32 = vrot.slane %v2684_v31, 1 }
 0xbff   : > { %v2686_v14 = vadd.f32 %v2685_v32, %v2684_v31 }
 0xc01   : > { %v2694_v38 = vmul.f32 %v2693_v35, %v2686_v14 }
 0xc03   : > { %v2695_v39 = vsub.f32 %v2674_v23, %v2694_v38 }
 0xc05   : > { %v2696_v40 = vmul.f32 %v2695_v39, %v2695_v39 }
 0xc07   : > { %v2697_v42 = vsel %vm2679_vm8, %v2696_v40, 0.0 }
 0xc08   : > { %v2698_v44 = vrot.slane %v2697_v42, 4 }
 0xc0a   : > { %v2699_v45 = vadd.f32 %v2698_v44, %v2697_v42 }
 0xc0c   : > { %v2700_v46 = vrot.slane %v2699_v45, 2 }
 0xc0e   : > { %v2701_v36 = vadd.f32 %v2700_v46, %v2699_v45 }
 0xc10   : > { %v2702_v47 = vrot.slane %v2701_v36, 1 }
 0xc12   : > { %v2703_v48 = vadd.f32 %v2702_v47, %v2701_v36 }
 0xc14   : > { %v2704_v49 = vmul.f32 %v2703_v48, %v2693_v35 }
 0xc16   : > { %v2705_v50 = vadd.f32 1e-05, %v2704_v49 }
 0xc18   : > { %3809 = vrsqrt.f32 %v2705_v50  ;;  %vm2712_vm11 = vweird.f32 %v2705_v50 }
 0xc1e   : > { %v3810_v52 = vpop.eup %3809 }
 0xc1f   : > { %v2707_v53 = vmul.f32 %v3810_v52, %v2705_v50  ;;  %vm2713_vm9 = vweird.f32 %v3810_v52 }
 0xc20   : > { %vm2714_vm12 = vmor %vm2712_vm11, %vm2713_vm9 }
 0xc21   : > { %v2708_v4 = vmul.f32 %v3810_v52, %v2707_v53 }
 0xc23   : > { %v2709_v55 = vmul.f32 0.5, %v2708_v4 }
 0xc25   : > { %v2710_v56 = vsub.f32 1.5, %v2709_v55 }
 0xc27   : > { %v2711_v7 = vmul.f32 %v3810_v52, %v2710_v56 }
 0xc29   : > { %v2715_v59 = vsel %vm2714_vm12, %v3810_v52, %v2711_v7 }
 0xc2a   : > { %v2716_v61 = vmul.f32 %v2715_v59, %v2695_v39 }
 0xc2c   : > { %v2720_v63 = vmul.f32 %v3801_v58, %v2716_v61 }
 0xc2e   : > { %v2724_v0 = vadd.f32 %v3802_v62, %v2720_v63 }
 0xc30   : > { %v2727_v1 = vsub.f32 %v2724_v0, %v2674_v23 }
 0xc32   : > { %3498 = vmatpush.msk.msra.mxu1 %vm2679_vm8, %v2727_v1 }
 0xc33   : > { %3499 = vmatmul.msk.f32.vlgmr.msra.gmra.mxu1 %vm2728_vm13, %v2725_v2 }
 0xc3b   : > { %3500 = vmatmul.msk.f32.gmra.mxu1 %vm2728_vm13, %v2726_v10 }
 0xcb0   : > { %v2755_v6 = vpop.f32.mrf.mxu1 }
 0xcb1   : > { %v2761_v34 = vadd.f32 %v2755_v6, %v4694_v18 }
 0xcb8   : > { %v2758_v8 = vpop.f32.mrf.mxu1 }
 0xcb9   : > { %v2762_v11 = vadd.f32 %v2758_v8, %v4687_v15 }
 0xcbb   : > { %v2763_v12 = vpack.c.bf16 %v2762_v11, %v2761_v34 }
 0xcbd   : > { %2836 = vmatmul.bf16.vlgmr.msra.gmra.mxu2 %v2763_v12 }
 0xd40   : > { %v2837_v13 = vpop.f32.mrf.mxu2 }
 0xd41   : > { %2842 = vst [vmem:[%s4828_s1] sm:$0xff] %v2837_v13 }
 0xd48   : > { %v2839_v27 = vpop.f32.mrf.mxu2 }
 0xd49   : > { %2843 = vst [vmem:[%s4828_s1 + $0x8] sm:$0xff] %v2839_v27 }
 0xd4a PF: > { %s4829_s28 = sld [smem:[#allocation10_spill]]  ;;  %s4831_s27 = smov %s3931_s3 }
 0xd4b   : > { %s4830_s18 = sld [smem:[#allocation11_spill]]  ;;  %s4832_s3 = smov %s3935_s7 }
 0xd50   : > { %p38_p8 = scmp.ge.s32.totalorder %s4829_s28, 4  }
 0xd51   : > { %s4833_s7 = smov %s4830_s18 }
 0xd52   :  { %40 = sbr.rel (!%p38_p8) target bundleno = 25 (0x19), region = 213 }
 0xd57   :  { %2861 = vsyncpa [#allocation4], 1 }
 0xd58   :  { %2863 = vsyncpa [#allocation4 + $0x1], 1 }
 0xd59   :  { %2864 = vsyncpa [#allocation6], 1 }

</bundles_post_ra>
